<compile_context>
chip_gen: v6e
topology: v6e:2x2x1
jax: 0.10.0
libtpu: 0.0.40
codegen_flags: <defaults>
</compile_context>

<pallas_src>
import math

import jax
import jax.numpy as jnp
from jax import lax
from jax.experimental import pallas as pl
from jax.experimental.pallas import tpu as pltpu

# ----------------------- small synthetic Gemma config -----------------------
VOCAB = 64
HIDDEN = 32
N_LAYERS = 2
N_HEADS = 4
N_KV_HEADS = 1            # Gemma-2b style MQA
HEAD_DIM = 8
INTERMEDIATE = 64
EPS = 1e-6
ROPE_THETA = 10000.0
LOGITS_PAD = 128          # lane-dense padded logits width (>= VOCAB)

Q_WIDTH = N_HEADS * HEAD_DIM            # 32
KV_WIDTH = N_KV_HEADS * HEAD_DIM        # 8
QKV_WIDTH = Q_WIDTH + 2 * KV_WIDTH      # 48


# ------------------------------ fused Pallas kernel ---------------------------
def _gemma_fused_kernel(x_ref, cos_ref, sin_ref, bias_ref,
                        in_scale_ref, post_scale_ref,
                        wqkv_ref, wo_ref, wgu_ref, wd_ref,
                        final_scale_ref, lm_head_ref,
                        o_ref):
    """Entire 2-layer Gemma forward on VMEM-resident data.

    x_ref:           [B*S, HIDDEN]     token embeddings (already * sqrt(HIDDEN))
    cos/sin_ref:     [B*S, HEAD_DIM]   per-row RoPE tables (tiled over batch)
    bias_ref:        [B*S, B*S]        block-diagonal causal additive bias
    in/post_scale:   [L, 1, HIDDEN]    (1 + rmsnorm weight), pre-attn / pre-MLP
    wqkv_ref:        [L, HIDDEN, 48]   fused Wq|Wk|Wv (Wq pre-scaled by 1/sqrt(Dh))
    wo_ref:          [L, 32, HIDDEN]
    wgu_ref:         [L, HIDDEN, 128]  fused Wgate|Wup
    wd_ref:          [L, 64, HIDDEN]
    final_scale_ref: [1, HIDDEN]       (1 + final rmsnorm weight)
    lm_head_ref:     [HIDDEN, 128]     embed.T zero-padded to 128 lanes
    o_ref:           [B*S, 128]        padded logits (lane-dense store)
    """
    f32 = jnp.float32
    half = HEAD_DIM // 2
    gelu_c = math.sqrt(2.0 / math.pi)

    h = x_ref[...]                                               # [M, H]
    cos = cos_ref[...]                                           # [M, Dh]
    sin = sin_ref[...]
    bias = bias_ref[...]                                         # [M, M]

    def rms(x):
        var = jnp.mean(x * x, axis=-1, keepdims=True)
        return x * lax.rsqrt(var + EPS)

    def rope(x):  # x: [M, HEAD_DIM]
        xr = jnp.concatenate([-x[:, half:], x[:, :half]], axis=-1)
        return x * cos + xr * sin

    def gelu_tanh(g):  # gelu_pytorch_tanh
        return 0.5 * g * (1.0 + jnp.tanh(gelu_c * (g + 0.044715 * g * g * g)))

    for li in range(N_LAYERS):
        # ---- self-attention block ----
        xn = rms(h) * in_scale_ref[li]                           # [M, H]
        qkv = jnp.dot(xn, wqkv_ref[li],
                      preferred_element_type=f32)                # [M, 48]
        q_all = qkv[:, :Q_WIDTH]                                 # [M, 32]
        k_rope = rope(qkv[:, Q_WIDTH:Q_WIDTH + KV_WIDTH])        # [M, 8] (single KV head)
        v_all = qkv[:, Q_WIDTH + KV_WIDTH:]                      # [M, 8]

        head_outs = []
        for hh in range(N_HEADS):
            q_h = rope(q_all[:, hh * HEAD_DIM:(hh + 1) * HEAD_DIM])
            s = jnp.einsum('qd,kd->qk', q_h, k_rope,
                           preferred_element_type=f32) + bias    # [M, M]
            m = jnp.max(s, axis=-1, keepdims=True)
            p = jnp.exp(s - m)
            l = jnp.sum(p, axis=-1, keepdims=True)
            p = p * pl.reciprocal(l, approx=True)                # EUP slot
            head_outs.append(jnp.dot(p, v_all,
                                     preferred_element_type=f32))  # [M, 8]
        attn2d = jnp.concatenate(head_outs, axis=-1)             # [M, 32]
        h = h + jnp.dot(attn2d, wo_ref[li], preferred_element_type=f32)

        # ---- MLP block (GeGLU), gate/up fused into one lane-dense matmul ----
        xn2 = rms(h) * post_scale_ref[li]
        gu = jnp.dot(xn2, wgu_ref[li], preferred_element_type=f32)  # [M, 128]
        g = gu[:, :INTERMEDIATE]
        u = gu[:, INTERMEDIATE:]
        h = h + jnp.dot(gelu_tanh(g) * u, wd_ref[li],
                        preferred_element_type=f32)

    # ---- final norm + tied lm_head (padded to 128 lanes) ----
    xf = rms(h) * final_scale_ref[...]
    o_ref[...] = jnp.dot(xf, lm_head_ref[...], preferred_element_type=f32)


def gemma_fused_call(x, packed):
    M = x.shape[0]
    vspec = pl.BlockSpec(memory_space=pltpu.MemorySpace.VMEM)
    return pl.pallas_call(
        _gemma_fused_kernel,
        out_shape=jax.ShapeDtypeStruct((M, LOGITS_PAD), jnp.float32),
        in_specs=[vspec] * 12,
        out_specs=vspec,
    )(x, packed['cos'], packed['sin'], packed['mask_bias'],
      packed['in_scale'], packed['post_scale'],
      packed['wqkv'], packed['wo'], packed['wgu'], packed['wd'],
      packed['final_scale'], packed['lm_head'])


# --------------------------- params / packing / model -------------------------
def rope_cos_sin(seq_len, dim=HEAD_DIM, theta=ROPE_THETA):
    inv_freq = 1.0 / (theta ** (jnp.arange(0, dim, 2, dtype=jnp.float32) / dim))
    pos = jnp.arange(seq_len, dtype=jnp.float32)
    freqs = pos[:, None] * inv_freq[None, :]          # [S, dim/2]
    emb = jnp.concatenate([freqs, freqs], axis=-1)    # [S, dim]
    return jnp.cos(emb), jnp.sin(emb)


def init_params(key):
    def nrm(k, shape):
        return jax.random.normal(k, shape, dtype=jnp.float32) * 0.02

    keys = jax.random.split(key, 1 + N_LAYERS)
    params = {
        'embed': nrm(keys[0], (VOCAB, HIDDEN)),
        'final_norm': jnp.zeros((HIDDEN,), jnp.float32),
        'layers': [],
    }
    for li in range(N_LAYERS):
        lk = jax.random.split(keys[1 + li], 7)
        params['layers'].append({
            'input_norm': jnp.zeros((HIDDEN,), jnp.float32),
            'post_norm': jnp.zeros((HIDDEN,), jnp.float32),
            'wq': nrm(lk[0], (HIDDEN, N_HEADS * HEAD_DIM)),
            'wk': nrm(lk[1], (HIDDEN, N_KV_HEADS * HEAD_DIM)),
            'wv': nrm(lk[2], (HIDDEN, N_KV_HEADS * HEAD_DIM)),
            'wo': nrm(lk[3], (N_HEADS * HEAD_DIM, HIDDEN)),
            'wg': nrm(lk[4], (HIDDEN, INTERMEDIATE)),
            'wu': nrm(lk[5], (HIDDEN, INTERMEDIATE)),
            'wd': nrm(lk[6], (INTERMEDIATE, HIDDEN)),
        })
    return params


def pack_params(params, batch, seq_len):
    """One-time (outside jit) packing: fuse/stack weights, fold constant
    scales, pad lm_head, precompute per-row RoPE tables + causal bias."""
    layers = params['layers']
    attn_scale = 1.0 / math.sqrt(HEAD_DIM)
    # Fold the attention softmax scale into Wq (RoPE is linear -> exact).
    wqkv = jnp.stack([jnp.concatenate([l['wq'] * attn_scale, l['wk'], l['wv']],
                                      axis=1)
                      for l in layers])                                 # [L,H,48]
    wo = jnp.stack([l['wo'] for l in layers])                           # [L,32,H]
    wgu = jnp.stack([jnp.concatenate([l['wg'], l['wu']], axis=1)
                     for l in layers])                                  # [L,H,128]
    wd = jnp.stack([l['wd'] for l in layers])                           # [L,64,H]
    in_scale = jnp.stack([(1.0 + l['input_norm']).reshape(1, HIDDEN)
                          for l in layers])                             # [L,1,H]
    post_scale = jnp.stack([(1.0 + l['post_norm']).reshape(1, HIDDEN)
                            for l in layers])                           # [L,1,H]
    final_scale = (1.0 + params['final_norm']).reshape(1, HIDDEN)

    lm_head = jnp.zeros((HIDDEN, LOGITS_PAD), jnp.float32)
    lm_head = lm_head.at[:, :VOCAB].set(params['embed'].T)              # tied head

    # Gemma embedding normalizer folded into the gather table.
    embed_scaled = params['embed'] * jnp.float32(math.sqrt(HIDDEN))

    # RoPE tables tiled per row of the flattened [B*S] hidden state.
    cos, sin = rope_cos_sin(seq_len)
    cos_full = jnp.tile(cos, (batch, 1))                                # [M,Dh]
    sin_full = jnp.tile(sin, (batch, 1))

    # Block-diagonal causal additive bias over the flattened rows.
    M = batch * seq_len
    pos = jnp.arange(M, dtype=jnp.int32)
    row, col = pos[:, None], pos[None, :]
    valid = (col <= row) & ((row // seq_len) == (col // seq_len))
    mask_bias = jnp.where(valid, 0.0, -1e30).astype(jnp.float32)        # [M,M]

    return {
        'embed': embed_scaled,
        'cos': cos_full, 'sin': sin_full, 'mask_bias': mask_bias,
        'in_scale': in_scale, 'post_scale': post_scale,
        'wqkv': wqkv, 'wo': wo, 'wgu': wgu, 'wd': wd,
        'final_scale': final_scale, 'lm_head': lm_head,
    }


def gemma_forward(packed, tokens):
    B, S = tokens.shape
    # Embedding gather kept in plain JAX (data-dependent gather).
    x = jnp.take(packed['embed'], tokens.reshape(-1), axis=0)  # [B*S, H] f32
    logits_pad = gemma_fused_call(x, packed)                   # [B*S, 128]
    return logits_pad[:, :VOCAB].reshape(B, S, VOCAB)


if __name__ == "__main__":
    key = jax.random.PRNGKey(0)
    pkey, tkey = jax.random.split(key)
    params = init_params(pkey)

    B, S = 2, 8
    packed = pack_params(params, B, S)
    tokens = jax.random.randint(tkey, (B, S), 0, VOCAB, dtype=jnp.int32)

    fwd = jax.jit(gemma_forward)
    logits = fwd(packed, tokens)
    jax.block_until_ready(logits)

    assert logits.shape == (B, S, VOCAB)
    assert logits.dtype == jnp.float32
    assert bool(jnp.all(jnp.isfinite(logits)))
    print("KERNEL_OK")
</pallas_src>

<mosaic_0001>
module attributes {stable_mosaic.version = 11 : i64} {
  func.func @_gemma_fused_kernel(%arg0: memref<16x32xf32, #tpu.memory_space<vmem>>, %arg1: memref<16x8xf32, #tpu.memory_space<vmem>>, %arg2: memref<16x8xf32, #tpu.memory_space<vmem>>, %arg3: memref<16x16xf32, #tpu.memory_space<vmem>>, %arg4: memref<2x1x32xf32, #tpu.memory_space<vmem>>, %arg5: memref<2x1x32xf32, #tpu.memory_space<vmem>>, %arg6: memref<2x32x48xf32, #tpu.memory_space<vmem>>, %arg7: memref<2x32x32xf32, #tpu.memory_space<vmem>>, %arg8: memref<2x32x128xf32, #tpu.memory_space<vmem>>, %arg9: memref<2x64x32xf32, #tpu.memory_space<vmem>>, %arg10: memref<1x32xf32, #tpu.memory_space<vmem>>, %arg11: memref<32x128xf32, #tpu.memory_space<vmem>>, %arg12: memref<16x128xf32, #tpu.memory_space<vmem>>) attributes {dimension_semantics = [], scalar_prefetch = 0 : i64, scratch_operands = 0 : i64, tpu.core_type = #tpu.core_type<tc>} {
    %c0 = arith.constant 0 : index
    %c0_0 = arith.constant 0 : index
    %0 = vector.load %arg0[%c0, %c0_0] : memref<16x32xf32, #tpu.memory_space<vmem>>, vector<16x32xf32>
    %c0_1 = arith.constant 0 : index
    %c0_2 = arith.constant 0 : index
    %1 = vector.load %arg1[%c0_1, %c0_2] : memref<16x8xf32, #tpu.memory_space<vmem>>, vector<16x8xf32>
    %c0_3 = arith.constant 0 : index
    %c0_4 = arith.constant 0 : index
    %2 = vector.load %arg2[%c0_3, %c0_4] : memref<16x8xf32, #tpu.memory_space<vmem>>, vector<16x8xf32>
    %c0_5 = arith.constant 0 : index
    %c0_6 = arith.constant 0 : index
    %3 = vector.load %arg3[%c0_5, %c0_6] : memref<16x16xf32, #tpu.memory_space<vmem>>, vector<16x16xf32>
    %4 = arith.mulf %0, %0 : vector<16x32xf32>
    %cst = arith.constant dense<0.000000e+00> : vector<16xf32>
    %5 = vector.multi_reduction <add>, %4, %cst [1] : vector<16x32xf32> to vector<16xf32>
    %6 = vector.shape_cast %5 : vector<16xf32> to vector<16x1xf32>
    %cst_7 = arith.constant 3.200000e+01 : f32
    %7 = vector.broadcast %cst_7 : f32 to vector<16x1xf32>
    %8 = arith.divf %6, %7 : vector<16x1xf32>
    %cst_8 = arith.constant 9.99999997E-7 : f32
    %9 = vector.broadcast %cst_8 : f32 to vector<16x1xf32>
    %10 = arith.addf %8, %9 : vector<16x1xf32>
    %11 = math.rsqrt %10 : vector<16x1xf32>
    %12 = vector.broadcast %11 : vector<16x1xf32> to vector<16x32xf32>
    %13 = arith.mulf %0, %12 : vector<16x32xf32>
    %c0_9 = arith.constant 0 : index
    %c0_10 = arith.constant 0 : index
    %c0_11 = arith.constant 0 : index
    %14 = vector.load %arg4[%c0_9, %c0_10, %c0_11] : memref<2x1x32xf32, #tpu.memory_space<vmem>>, vector<1x1x32xf32>
    %15 = vector.shape_cast %14 : vector<1x1x32xf32> to vector<1x32xf32>
    %16 = vector.broadcast %15 : vector<1x32xf32> to vector<16x32xf32>
    %17 = arith.mulf %13, %16 : vector<16x32xf32>
    %c0_12 = arith.constant 0 : index
    %c0_13 = arith.constant 0 : index
    %c0_14 = arith.constant 0 : index
    %18 = vector.load %arg6[%c0_12, %c0_13, %c0_14] : memref<2x32x48xf32, #tpu.memory_space<vmem>>, vector<1x32x48xf32>
    %19 = vector.shape_cast %18 : vector<1x32x48xf32> to vector<32x48xf32>
    %cst_15 = arith.constant dense<0.000000e+00> : vector<16x48xf32>
    %20 = tpu.matmul %17, %19, %cst_15 {dimension_numbers = #tpu.dot_dimension_numbers<[1], [0], [0], [1], [0, 0, 1, 1], [], []>} : vector<16x32xf32>, vector<32x48xf32>, vector<16x48xf32> -> vector<16x48xf32>
    %21 = vector.extract_strided_slice %20 {offsets = [0, 0], sizes = [16, 32], strides = [1, 1]} : vector<16x48xf32> to vector<16x32xf32>
    %22 = vector.extract_strided_slice %20 {offsets = [0, 32], sizes = [16, 8], strides = [1, 1]} : vector<16x48xf32> to vector<16x8xf32>
    %23 = vector.extract_strided_slice %22 {offsets = [0, 4], sizes = [16, 4], strides = [1, 1]} : vector<16x8xf32> to vector<16x4xf32>
    %cst_16 = arith.constant 0.000000e+00 : f32
    %24 = vector.broadcast %cst_16 : f32 to vector<16x4xf32>
    %25 = arith.subf %24, %23 : vector<16x4xf32>
    %26 = vector.extract_strided_slice %22 {offsets = [0, 0], sizes = [16, 4], strides = [1, 1]} : vector<16x8xf32> to vector<16x4xf32>
    %27 = tpu.concatenate %25, %26 in 1 : vector<16x4xf32>, vector<16x4xf32> -> vector<16x8xf32>
    %28 = arith.mulf %22, %1 : vector<16x8xf32>
    %29 = arith.mulf %27, %2 : vector<16x8xf32>
    %30 = arith.addf %28, %29 : vector<16x8xf32>
    %31 = vector.extract_strided_slice %20 {offsets = [0, 40], sizes = [16, 8], strides = [1, 1]} : vector<16x48xf32> to vector<16x8xf32>
    %32 = vector.extract_strided_slice %21 {offsets = [0, 0], sizes = [16, 8], strides = [1, 1]} : vector<16x32xf32> to vector<16x8xf32>
    %33 = vector.extract_strided_slice %32 {offsets = [0, 4], sizes = [16, 4], strides = [1, 1]} : vector<16x8xf32> to vector<16x4xf32>
    %cst_17 = arith.constant 0.000000e+00 : f32
    %34 = vector.broadcast %cst_17 : f32 to vector<16x4xf32>
    %35 = arith.subf %34, %33 : vector<16x4xf32>
    %36 = vector.extract_strided_slice %32 {offsets = [0, 0], sizes = [16, 4], strides = [1, 1]} : vector<16x8xf32> to vector<16x4xf32>
    %37 = tpu.concatenate %35, %36 in 1 : vector<16x4xf32>, vector<16x4xf32> -> vector<16x8xf32>
    %38 = arith.mulf %32, %1 : vector<16x8xf32>
    %39 = arith.mulf %37, %2 : vector<16x8xf32>
    %40 = arith.addf %38, %39 : vector<16x8xf32>
    "tpu.trace_start"() <{level = 10 : i32, message = "qd,kd->qk"}> : () -> ()
    %cst_18 = arith.constant dense<0.000000e+00> : vector<16x16xf32>
    %41 = tpu.matmul %40, %30, %cst_18 {dimension_numbers = #tpu.dot_dimension_numbers<[1], [1], [0], [0], [0, 0, 1, 0], [], []>} : vector<16x8xf32>, vector<16x8xf32>, vector<16x16xf32> -> vector<16x16xf32>
    "tpu.trace_stop"() : () -> ()
    %42 = arith.addf %41, %3 : vector<16x16xf32>
    %cst_19 = arith.constant dense<0xFF800000> : vector<16xf32>
    %43 = vector.multi_reduction <maximumf>, %42, %cst_19 [1] : vector<16x16xf32> to vector<16xf32>
    %44 = vector.shape_cast %43 : vector<16xf32> to vector<16x1xf32>
    %45 = vector.broadcast %44 : vector<16x1xf32> to vector<16x16xf32>
    %46 = arith.subf %42, %45 : vector<16x16xf32>
    %47 = math.exp %46 : vector<16x16xf32>
    %cst_20 = arith.constant dense<0.000000e+00> : vector<16xf32>
    %48 = vector.multi_reduction <add>, %47, %cst_20 [1] : vector<16x16xf32> to vector<16xf32>
    %49 = vector.shape_cast %48 : vector<16xf32> to vector<16x1xf32>
    %50 = tpu.reciprocal %49 {approx = true} : vector<16x1xf32> -> vector<16x1xf32>
    %51 = vector.broadcast %50 : vector<16x1xf32> to vector<16x16xf32>
    %52 = arith.mulf %47, %51 : vector<16x16xf32>
    %cst_21 = arith.constant dense<0.000000e+00> : vector<16x8xf32>
    %53 = tpu.matmul %52, %31, %cst_21 {dimension_numbers = #tpu.dot_dimension_numbers<[1], [0], [0], [1], [0, 0, 1, 1], [], []>} : vector<16x16xf32>, vector<16x8xf32>, vector<16x8xf32> -> vector<16x8xf32>
    %54 = vector.extract_strided_slice %21 {offsets = [0, 8], sizes = [16, 8], strides = [1, 1]} : vector<16x32xf32> to vector<16x8xf32>
    %55 = vector.extract_strided_slice %54 {offsets = [0, 4], sizes = [16, 4], strides = [1, 1]} : vector<16x8xf32> to vector<16x4xf32>
    %cst_22 = arith.constant 0.000000e+00 : f32
    %56 = vector.broadcast %cst_22 : f32 to vector<16x4xf32>
    %57 = arith.subf %56, %55 : vector<16x4xf32>
    %58 = vector.extract_strided_slice %54 {offsets = [0, 0], sizes = [16, 4], strides = [1, 1]} : vector<16x8xf32> to vector<16x4xf32>
    %59 = tpu.concatenate %57, %58 in 1 : vector<16x4xf32>, vector<16x4xf32> -> vector<16x8xf32>
    %60 = arith.mulf %54, %1 : vector<16x8xf32>
    %61 = arith.mulf %59, %2 : vector<16x8xf32>
    %62 = arith.addf %60, %61 : vector<16x8xf32>
    "tpu.trace_start"() <{level = 10 : i32, message = "qd,kd->qk"}> : () -> ()
    %cst_23 = arith.constant dense<0.000000e+00> : vector<16x16xf32>
    %63 = tpu.matmul %62, %30, %cst_23 {dimension_numbers = #tpu.dot_dimension_numbers<[1], [1], [0], [0], [0, 0, 1, 0], [], []>} : vector<16x8xf32>, vector<16x8xf32>, vector<16x16xf32> -> vector<16x16xf32>
    "tpu.trace_stop"() : () -> ()
    %64 = arith.addf %63, %3 : vector<16x16xf32>
    %cst_24 = arith.constant dense<0xFF800000> : vector<16xf32>
    %65 = vector.multi_reduction <maximumf>, %64, %cst_24 [1] : vector<16x16xf32> to vector<16xf32>
    %66 = vector.shape_cast %65 : vector<16xf32> to vector<16x1xf32>
    %67 = vector.broadcast %66 : vector<16x1xf32> to vector<16x16xf32>
    %68 = arith.subf %64, %67 : vector<16x16xf32>
    %69 = math.exp %68 : vector<16x16xf32>
    %cst_25 = arith.constant dense<0.000000e+00> : vector<16xf32>
    %70 = vector.multi_reduction <add>, %69, %cst_25 [1] : vector<16x16xf32> to vector<16xf32>
    %71 = vector.shape_cast %70 : vector<16xf32> to vector<16x1xf32>
    %72 = tpu.reciprocal %71 {approx = true} : vector<16x1xf32> -> vector<16x1xf32>
    %73 = vector.broadcast %72 : vector<16x1xf32> to vector<16x16xf32>
    %74 = arith.mulf %69, %73 : vector<16x16xf32>
    %cst_26 = arith.constant dense<0.000000e+00> : vector<16x8xf32>
    %75 = tpu.matmul %74, %31, %cst_26 {dimension_numbers = #tpu.dot_dimension_numbers<[1], [0], [0], [1], [0, 0, 1, 1], [], []>} : vector<16x16xf32>, vector<16x8xf32>, vector<16x8xf32> -> vector<16x8xf32>
    %76 = vector.extract_strided_slice %21 {offsets = [0, 16], sizes = [16, 8], strides = [1, 1]} : vector<16x32xf32> to vector<16x8xf32>
    %77 = vector.extract_strided_slice %76 {offsets = [0, 4], sizes = [16, 4], strides = [1, 1]} : vector<16x8xf32> to vector<16x4xf32>
    %cst_27 = arith.constant 0.000000e+00 : f32
    %78 = vector.broadcast %cst_27 : f32 to vector<16x4xf32>
    %79 = arith.subf %78, %77 : vector<16x4xf32>
    %80 = vector.extract_strided_slice %76 {offsets = [0, 0], sizes = [16, 4], strides = [1, 1]} : vector<16x8xf32> to vector<16x4xf32>
    %81 = tpu.concatenate %79, %80 in 1 : vector<16x4xf32>, vector<16x4xf32> -> vector<16x8xf32>
    %82 = arith.mulf %76, %1 : vector<16x8xf32>
    %83 = arith.mulf %81, %2 : vector<16x8xf32>
    %84 = arith.addf %82, %83 : vector<16x8xf32>
    "tpu.trace_start"() <{level = 10 : i32, message = "qd,kd->qk"}> : () -> ()
    %cst_28 = arith.constant dense<0.000000e+00> : vector<16x16xf32>
    %85 = tpu.matmul %84, %30, %cst_28 {dimension_numbers = #tpu.dot_dimension_numbers<[1], [1], [0], [0], [0, 0, 1, 0], [], []>} : vector<16x8xf32>, vector<16x8xf32>, vector<16x16xf32> -> vector<16x16xf32>
    "tpu.trace_stop"() : () -> ()
    %86 = arith.addf %85, %3 : vector<16x16xf32>
    %cst_29 = arith.constant dense<0xFF800000> : vector<16xf32>
    %87 = vector.multi_reduction <maximumf>, %86, %cst_29 [1] : vector<16x16xf32> to vector<16xf32>
    %88 = vector.shape_cast %87 : vector<16xf32> to vector<16x1xf32>
    %89 = vector.broadcast %88 : vector<16x1xf32> to vector<16x16xf32>
    %90 = arith.subf %86, %89 : vector<16x16xf32>
    %91 = math.exp %90 : vector<16x16xf32>
    %cst_30 = arith.constant dense<0.000000e+00> : vector<16xf32>
    %92 = vector.multi_reduction <add>, %91, %cst_30 [1] : vector<16x16xf32> to vector<16xf32>
    %93 = vector.shape_cast %92 : vector<16xf32> to vector<16x1xf32>
    %94 = tpu.reciprocal %93 {approx = true} : vector<16x1xf32> -> vector<16x1xf32>
    %95 = vector.broadcast %94 : vector<16x1xf32> to vector<16x16xf32>
    %96 = arith.mulf %91, %95 : vector<16x16xf32>
    %cst_31 = arith.constant dense<0.000000e+00> : vector<16x8xf32>
    %97 = tpu.matmul %96, %31, %cst_31 {dimension_numbers = #tpu.dot_dimension_numbers<[1], [0], [0], [1], [0, 0, 1, 1], [], []>} : vector<16x16xf32>, vector<16x8xf32>, vector<16x8xf32> -> vector<16x8xf32>
    %98 = vector.extract_strided_slice %21 {offsets = [0, 24], sizes = [16, 8], strides = [1, 1]} : vector<16x32xf32> to vector<16x8xf32>
    %99 = vector.extract_strided_slice %98 {offsets = [0, 4], sizes = [16, 4], strides = [1, 1]} : vector<16x8xf32> to vector<16x4xf32>
    %cst_32 = arith.constant 0.000000e+00 : f32
    %100 = vector.broadcast %cst_32 : f32 to vector<16x4xf32>
    %101 = arith.subf %100, %99 : vector<16x4xf32>
    %102 = vector.extract_strided_slice %98 {offsets = [0, 0], sizes = [16, 4], strides = [1, 1]} : vector<16x8xf32> to vector<16x4xf32>
    %103 = tpu.concatenate %101, %102 in 1 : vector<16x4xf32>, vector<16x4xf32> -> vector<16x8xf32>
    %104 = arith.mulf %98, %1 : vector<16x8xf32>
    %105 = arith.mulf %103, %2 : vector<16x8xf32>
    %106 = arith.addf %104, %105 : vector<16x8xf32>
    "tpu.trace_start"() <{level = 10 : i32, message = "qd,kd->qk"}> : () -> ()
    %cst_33 = arith.constant dense<0.000000e+00> : vector<16x16xf32>
    %107 = tpu.matmul %106, %30, %cst_33 {dimension_numbers = #tpu.dot_dimension_numbers<[1], [1], [0], [0], [0, 0, 1, 0], [], []>} : vector<16x8xf32>, vector<16x8xf32>, vector<16x16xf32> -> vector<16x16xf32>
    "tpu.trace_stop"() : () -> ()
    %108 = arith.addf %107, %3 : vector<16x16xf32>
    %cst_34 = arith.constant dense<0xFF800000> : vector<16xf32>
    %109 = vector.multi_reduction <maximumf>, %108, %cst_34 [1] : vector<16x16xf32> to vector<16xf32>
    %110 = vector.shape_cast %109 : vector<16xf32> to vector<16x1xf32>
    %111 = vector.broadcast %110 : vector<16x1xf32> to vector<16x16xf32>
    %112 = arith.subf %108, %111 : vector<16x16xf32>
    %113 = math.exp %112 : vector<16x16xf32>
    %cst_35 = arith.constant dense<0.000000e+00> : vector<16xf32>
    %114 = vector.multi_reduction <add>, %113, %cst_35 [1] : vector<16x16xf32> to vector<16xf32>
    %115 = vector.shape_cast %114 : vector<16xf32> to vector<16x1xf32>
    %116 = tpu.reciprocal %115 {approx = true} : vector<16x1xf32> -> vector<16x1xf32>
    %117 = vector.broadcast %116 : vector<16x1xf32> to vector<16x16xf32>
    %118 = arith.mulf %113, %117 : vector<16x16xf32>
    %cst_36 = arith.constant dense<0.000000e+00> : vector<16x8xf32>
    %119 = tpu.matmul %118, %31, %cst_36 {dimension_numbers = #tpu.dot_dimension_numbers<[1], [0], [0], [1], [0, 0, 1, 1], [], []>} : vector<16x16xf32>, vector<16x8xf32>, vector<16x8xf32> -> vector<16x8xf32>
    %120 = tpu.concatenate %53, %75, %97, %119 in 1 : vector<16x8xf32>, vector<16x8xf32>, vector<16x8xf32>, vector<16x8xf32> -> vector<16x32xf32>
    %c0_37 = arith.constant 0 : index
    %c0_38 = arith.constant 0 : index
    %c0_39 = arith.constant 0 : index
    %121 = vector.load %arg7[%c0_37, %c0_38, %c0_39] : memref<2x32x32xf32, #tpu.memory_space<vmem>>, vector<1x32x32xf32>
    %122 = vector.shape_cast %121 : vector<1x32x32xf32> to vector<32x32xf32>
    %cst_40 = arith.constant dense<0.000000e+00> : vector<16x32xf32>
    %123 = tpu.matmul %120, %122, %cst_40 {dimension_numbers = #tpu.dot_dimension_numbers<[1], [0], [0], [1], [0, 0, 1, 1], [], []>} : vector<16x32xf32>, vector<32x32xf32>, vector<16x32xf32> -> vector<16x32xf32>
    %124 = arith.addf %0, %123 : vector<16x32xf32>
    %125 = arith.mulf %124, %124 : vector<16x32xf32>
    %cst_41 = arith.constant dense<0.000000e+00> : vector<16xf32>
    %126 = vector.multi_reduction <add>, %125, %cst_41 [1] : vector<16x32xf32> to vector<16xf32>
    %127 = vector.shape_cast %126 : vector<16xf32> to vector<16x1xf32>
    %cst_42 = arith.constant 3.200000e+01 : f32
    %128 = vector.broadcast %cst_42 : f32 to vector<16x1xf32>
    %129 = arith.divf %127, %128 : vector<16x1xf32>
    %cst_43 = arith.constant 9.99999997E-7 : f32
    %130 = vector.broadcast %cst_43 : f32 to vector<16x1xf32>
    %131 = arith.addf %129, %130 : vector<16x1xf32>
    %132 = math.rsqrt %131 : vector<16x1xf32>
    %133 = vector.broadcast %132 : vector<16x1xf32> to vector<16x32xf32>
    %134 = arith.mulf %124, %133 : vector<16x32xf32>
    %c0_44 = arith.constant 0 : index
    %c0_45 = arith.constant 0 : index
    %c0_46 = arith.constant 0 : index
    %135 = vector.load %arg5[%c0_44, %c0_45, %c0_46] : memref<2x1x32xf32, #tpu.memory_space<vmem>>, vector<1x1x32xf32>
    %136 = vector.shape_cast %135 : vector<1x1x32xf32> to vector<1x32xf32>
    %137 = vector.broadcast %136 : vector<1x32xf32> to vector<16x32xf32>
    %138 = arith.mulf %134, %137 : vector<16x32xf32>
    %c0_47 = arith.constant 0 : index
    %c0_48 = arith.constant 0 : index
    %c0_49 = arith.constant 0 : index
    %139 = vector.load %arg8[%c0_47, %c0_48, %c0_49] : memref<2x32x128xf32, #tpu.memory_space<vmem>>, vector<1x32x128xf32>
    %140 = vector.shape_cast %139 : vector<1x32x128xf32> to vector<32x128xf32>
    %cst_50 = arith.constant dense<0.000000e+00> : vector<16x128xf32>
    %141 = tpu.matmul %138, %140, %cst_50 {dimension_numbers = #tpu.dot_dimension_numbers<[1], [0], [0], [1], [0, 0, 1, 1], [], []>} : vector<16x32xf32>, vector<32x128xf32>, vector<16x128xf32> -> vector<16x128xf32>
    %142 = vector.extract_strided_slice %141 {offsets = [0, 0], sizes = [16, 64], strides = [1, 1]} : vector<16x128xf32> to vector<16x64xf32>
    %143 = vector.extract_strided_slice %141 {offsets = [0, 64], sizes = [16, 64], strides = [1, 1]} : vector<16x128xf32> to vector<16x64xf32>
    %cst_51 = arith.constant 5.000000e-01 : f32
    %144 = vector.broadcast %cst_51 : f32 to vector<16x64xf32>
    %145 = arith.mulf %144, %142 : vector<16x64xf32>
    %cst_52 = arith.constant 4.471500e-02 : f32
    %146 = vector.broadcast %cst_52 : f32 to vector<16x64xf32>
    %147 = arith.mulf %146, %142 : vector<16x64xf32>
    %148 = arith.mulf %147, %142 : vector<16x64xf32>
    %149 = arith.mulf %148, %142 : vector<16x64xf32>
    %150 = arith.addf %142, %149 : vector<16x64xf32>
    %cst_53 = arith.constant 0.797884583 : f32
    %151 = vector.broadcast %cst_53 : f32 to vector<16x64xf32>
    %152 = arith.mulf %151, %150 : vector<16x64xf32>
    %153 = math.tanh %152 : vector<16x64xf32>
    %cst_54 = arith.constant 1.000000e+00 : f32
    %154 = vector.broadcast %cst_54 : f32 to vector<16x64xf32>
    %155 = arith.addf %154, %153 : vector<16x64xf32>
    %156 = arith.mulf %145, %155 : vector<16x64xf32>
    %157 = arith.mulf %156, %143 : vector<16x64xf32>
    %c0_55 = arith.constant 0 : index
    %c0_56 = arith.constant 0 : index
    %c0_57 = arith.constant 0 : index
    %158 = vector.load %arg9[%c0_55, %c0_56, %c0_57] : memref<2x64x32xf32, #tpu.memory_space<vmem>>, vector<1x64x32xf32>
    %159 = vector.shape_cast %158 : vector<1x64x32xf32> to vector<64x32xf32>
    %cst_58 = arith.constant dense<0.000000e+00> : vector<16x32xf32>
    %160 = tpu.matmul %157, %159, %cst_58 {dimension_numbers = #tpu.dot_dimension_numbers<[1], [0], [0], [1], [0, 0, 1, 1], [], []>} : vector<16x64xf32>, vector<64x32xf32>, vector<16x32xf32> -> vector<16x32xf32>
    %161 = arith.addf %124, %160 : vector<16x32xf32>
    %162 = arith.mulf %161, %161 : vector<16x32xf32>
    %cst_59 = arith.constant dense<0.000000e+00> : vector<16xf32>
    %163 = vector.multi_reduction <add>, %162, %cst_59 [1] : vector<16x32xf32> to vector<16xf32>
    %164 = vector.shape_cast %163 : vector<16xf32> to vector<16x1xf32>
    %cst_60 = arith.constant 3.200000e+01 : f32
    %165 = vector.broadcast %cst_60 : f32 to vector<16x1xf32>
    %166 = arith.divf %164, %165 : vector<16x1xf32>
    %cst_61 = arith.constant 9.99999997E-7 : f32
    %167 = vector.broadcast %cst_61 : f32 to vector<16x1xf32>
    %168 = arith.addf %166, %167 : vector<16x1xf32>
    %169 = math.rsqrt %168 : vector<16x1xf32>
    %170 = vector.broadcast %169 : vector<16x1xf32> to vector<16x32xf32>
    %171 = arith.mulf %161, %170 : vector<16x32xf32>
    %c1 = arith.constant 1 : index
    %c0_62 = arith.constant 0 : index
    %c0_63 = arith.constant 0 : index
    %172 = vector.load %arg4[%c1, %c0_62, %c0_63] : memref<2x1x32xf32, #tpu.memory_space<vmem>>, vector<1x1x32xf32>
    %173 = vector.shape_cast %172 : vector<1x1x32xf32> to vector<1x32xf32>
    %174 = vector.broadcast %173 : vector<1x32xf32> to vector<16x32xf32>
    %175 = arith.mulf %171, %174 : vector<16x32xf32>
    %c1_64 = arith.constant 1 : index
    %c0_65 = arith.constant 0 : index
    %c0_66 = arith.constant 0 : index
    %176 = vector.load %arg6[%c1_64, %c0_65, %c0_66] : memref<2x32x48xf32, #tpu.memory_space<vmem>>, vector<1x32x48xf32>
    %177 = vector.shape_cast %176 : vector<1x32x48xf32> to vector<32x48xf32>
    %cst_67 = arith.constant dense<0.000000e+00> : vector<16x48xf32>
    %178 = tpu.matmul %175, %177, %cst_67 {dimension_numbers = #tpu.dot_dimension_numbers<[1], [0], [0], [1], [0, 0, 1, 1], [], []>} : vector<16x32xf32>, vector<32x48xf32>, vector<16x48xf32> -> vector<16x48xf32>
    %179 = vector.extract_strided_slice %178 {offsets = [0, 0], sizes = [16, 32], strides = [1, 1]} : vector<16x48xf32> to vector<16x32xf32>
    %180 = vector.extract_strided_slice %178 {offsets = [0, 32], sizes = [16, 8], strides = [1, 1]} : vector<16x48xf32> to vector<16x8xf32>
    %181 = vector.extract_strided_slice %180 {offsets = [0, 4], sizes = [16, 4], strides = [1, 1]} : vector<16x8xf32> to vector<16x4xf32>
    %cst_68 = arith.constant 0.000000e+00 : f32
    %182 = vector.broadcast %cst_68 : f32 to vector<16x4xf32>
    %183 = arith.subf %182, %181 : vector<16x4xf32>
    %184 = vector.extract_strided_slice %180 {offsets = [0, 0], sizes = [16, 4], strides = [1, 1]} : vector<16x8xf32> to vector<16x4xf32>
    %185 = tpu.concatenate %183, %184 in 1 : vector<16x4xf32>, vector<16x4xf32> -> vector<16x8xf32>
    %186 = arith.mulf %180, %1 : vector<16x8xf32>
    %187 = arith.mulf %185, %2 : vector<16x8xf32>
    %188 = arith.addf %186, %187 : vector<16x8xf32>
    %189 = vector.extract_strided_slice %178 {offsets = [0, 40], sizes = [16, 8], strides = [1, 1]} : vector<16x48xf32> to vector<16x8xf32>
    %190 = vector.extract_strided_slice %179 {offsets = [0, 0], sizes = [16, 8], strides = [1, 1]} : vector<16x32xf32> to vector<16x8xf32>
    %191 = vector.extract_strided_slice %190 {offsets = [0, 4], sizes = [16, 4], strides = [1, 1]} : vector<16x8xf32> to vector<16x4xf32>
    %cst_69 = arith.constant 0.000000e+00 : f32
    %192 = vector.broadcast %cst_69 : f32 to vector<16x4xf32>
    %193 = arith.subf %192, %191 : vector<16x4xf32>
    %194 = vector.extract_strided_slice %190 {offsets = [0, 0], sizes = [16, 4], strides = [1, 1]} : vector<16x8xf32> to vector<16x4xf32>
    %195 = tpu.concatenate %193, %194 in 1 : vector<16x4xf32>, vector<16x4xf32> -> vector<16x8xf32>
    %196 = arith.mulf %190, %1 : vector<16x8xf32>
    %197 = arith.mulf %195, %2 : vector<16x8xf32>
    %198 = arith.addf %196, %197 : vector<16x8xf32>
    "tpu.trace_start"() <{level = 10 : i32, message = "qd,kd->qk"}> : () -> ()
    %cst_70 = arith.constant dense<0.000000e+00> : vector<16x16xf32>
    %199 = tpu.matmul %198, %188, %cst_70 {dimension_numbers = #tpu.dot_dimension_numbers<[1], [1], [0], [0], [0, 0, 1, 0], [], []>} : vector<16x8xf32>, vector<16x8xf32>, vector<16x16xf32> -> vector<16x16xf32>
    "tpu.trace_stop"() : () -> ()
    %200 = arith.addf %199, %3 : vector<16x16xf32>
    %cst_71 = arith.constant dense<0xFF800000> : vector<16xf32>
    %201 = vector.multi_reduction <maximumf>, %200, %cst_71 [1] : vector<16x16xf32> to vector<16xf32>
    %202 = vector.shape_cast %201 : vector<16xf32> to vector<16x1xf32>
    %203 = vector.broadcast %202 : vector<16x1xf32> to vector<16x16xf32>
    %204 = arith.subf %200, %203 : vector<16x16xf32>
    %205 = math.exp %204 : vector<16x16xf32>
    %cst_72 = arith.constant dense<0.000000e+00> : vector<16xf32>
    %206 = vector.multi_reduction <add>, %205, %cst_72 [1] : vector<16x16xf32> to vector<16xf32>
    %207 = vector.shape_cast %206 : vector<16xf32> to vector<16x1xf32>
    %208 = tpu.reciprocal %207 {approx = true} : vector<16x1xf32> -> vector<16x1xf32>
    %209 = vector.broadcast %208 : vector<16x1xf32> to vector<16x16xf32>
    %210 = arith.mulf %205, %209 : vector<16x16xf32>
    %cst_73 = arith.constant dense<0.000000e+00> : vector<16x8xf32>
    %211 = tpu.matmul %210, %189, %cst_73 {dimension_numbers = #tpu.dot_dimension_numbers<[1], [0], [0], [1], [0, 0, 1, 1], [], []>} : vector<16x16xf32>, vector<16x8xf32>, vector<16x8xf32> -> vector<16x8xf32>
    %212 = vector.extract_strided_slice %179 {offsets = [0, 8], sizes = [16, 8], strides = [1, 1]} : vector<16x32xf32> to vector<16x8xf32>
    %213 = vector.extract_strided_slice %212 {offsets = [0, 4], sizes = [16, 4], strides = [1, 1]} : vector<16x8xf32> to vector<16x4xf32>
    %cst_74 = arith.constant 0.000000e+00 : f32
    %214 = vector.broadcast %cst_74 : f32 to vector<16x4xf32>
    %215 = arith.subf %214, %213 : vector<16x4xf32>
    %216 = vector.extract_strided_slice %212 {offsets = [0, 0], sizes = [16, 4], strides = [1, 1]} : vector<16x8xf32> to vector<16x4xf32>
    %217 = tpu.concatenate %215, %216 in 1 : vector<16x4xf32>, vector<16x4xf32> -> vector<16x8xf32>
    %218 = arith.mulf %212, %1 : vector<16x8xf32>
    %219 = arith.mulf %217, %2 : vector<16x8xf32>
    %220 = arith.addf %218, %219 : vector<16x8xf32>
    "tpu.trace_start"() <{level = 10 : i32, message = "qd,kd->qk"}> : () -> ()
    %cst_75 = arith.constant dense<0.000000e+00> : vector<16x16xf32>
    %221 = tpu.matmul %220, %188, %cst_75 {dimension_numbers = #tpu.dot_dimension_numbers<[1], [1], [0], [0], [0, 0, 1, 0], [], []>} : vector<16x8xf32>, vector<16x8xf32>, vector<16x16xf32> -> vector<16x16xf32>
    "tpu.trace_stop"() : () -> ()
    %222 = arith.addf %221, %3 : vector<16x16xf32>
    %cst_76 = arith.constant dense<0xFF800000> : vector<16xf32>
    %223 = vector.multi_reduction <maximumf>, %222, %cst_76 [1] : vector<16x16xf32> to vector<16xf32>
    %224 = vector.shape_cast %223 : vector<16xf32> to vector<16x1xf32>
    %225 = vector.broadcast %224 : vector<16x1xf32> to vector<16x16xf32>
    %226 = arith.subf %222, %225 : vector<16x16xf32>
    %227 = math.exp %226 : vector<16x16xf32>
    %cst_77 = arith.constant dense<0.000000e+00> : vector<16xf32>
    %228 = vector.multi_reduction <add>, %227, %cst_77 [1] : vector<16x16xf32> to vector<16xf32>
    %229 = vector.shape_cast %228 : vector<16xf32> to vector<16x1xf32>
    %230 = tpu.reciprocal %229 {approx = true} : vector<16x1xf32> -> vector<16x1xf32>
    %231 = vector.broadcast %230 : vector<16x1xf32> to vector<16x16xf32>
    %232 = arith.mulf %227, %231 : vector<16x16xf32>
    %cst_78 = arith.constant dense<0.000000e+00> : vector<16x8xf32>
    %233 = tpu.matmul %232, %189, %cst_78 {dimension_numbers = #tpu.dot_dimension_numbers<[1], [0], [0], [1], [0, 0, 1, 1], [], []>} : vector<16x16xf32>, vector<16x8xf32>, vector<16x8xf32> -> vector<16x8xf32>
    %234 = vector.extract_strided_slice %179 {offsets = [0, 16], sizes = [16, 8], strides = [1, 1]} : vector<16x32xf32> to vector<16x8xf32>
    %235 = vector.extract_strided_slice %234 {offsets = [0, 4], sizes = [16, 4], strides = [1, 1]} : vector<16x8xf32> to vector<16x4xf32>
    %cst_79 = arith.constant 0.000000e+00 : f32
    %236 = vector.broadcast %cst_79 : f32 to vector<16x4xf32>
    %237 = arith.subf %236, %235 : vector<16x4xf32>
    %238 = vector.extract_strided_slice %234 {offsets = [0, 0], sizes = [16, 4], strides = [1, 1]} : vector<16x8xf32> to vector<16x4xf32>
    %239 = tpu.concatenate %237, %238 in 1 : vector<16x4xf32>, vector<16x4xf32> -> vector<16x8xf32>
    %240 = arith.mulf %234, %1 : vector<16x8xf32>
    %241 = arith.mulf %239, %2 : vector<16x8xf32>
    %242 = arith.addf %240, %241 : vector<16x8xf32>
    "tpu.trace_start"() <{level = 10 : i32, message = "qd,kd->qk"}> : () -> ()
    %cst_80 = arith.constant dense<0.000000e+00> : vector<16x16xf32>
    %243 = tpu.matmul %242, %188, %cst_80 {dimension_numbers = #tpu.dot_dimension_numbers<[1], [1], [0], [0], [0, 0, 1, 0], [], []>} : vector<16x8xf32>, vector<16x8xf32>, vector<16x16xf32> -> vector<16x16xf32>
    "tpu.trace_stop"() : () -> ()
    %244 = arith.addf %243, %3 : vector<16x16xf32>
    %cst_81 = arith.constant dense<0xFF800000> : vector<16xf32>
    %245 = vector.multi_reduction <maximumf>, %244, %cst_81 [1] : vector<16x16xf32> to vector<16xf32>
    %246 = vector.shape_cast %245 : vector<16xf32> to vector<16x1xf32>
    %247 = vector.broadcast %246 : vector<16x1xf32> to vector<16x16xf32>
    %248 = arith.subf %244, %247 : vector<16x16xf32>
    %249 = math.exp %248 : vector<16x16xf32>
    %cst_82 = arith.constant dense<0.000000e+00> : vector<16xf32>
    %250 = vector.multi_reduction <add>, %249, %cst_82 [1] : vector<16x16xf32> to vector<16xf32>
    %251 = vector.shape_cast %250 : vector<16xf32> to vector<16x1xf32>
    %252 = tpu.reciprocal %251 {approx = true} : vector<16x1xf32> -> vector<16x1xf32>
    %253 = vector.broadcast %252 : vector<16x1xf32> to vector<16x16xf32>
    %254 = arith.mulf %249, %253 : vector<16x16xf32>
    %cst_83 = arith.constant dense<0.000000e+00> : vector<16x8xf32>
    %255 = tpu.matmul %254, %189, %cst_83 {dimension_numbers = #tpu.dot_dimension_numbers<[1], [0], [0], [1], [0, 0, 1, 1], [], []>} : vector<16x16xf32>, vector<16x8xf32>, vector<16x8xf32> -> vector<16x8xf32>
    %256 = vector.extract_strided_slice %179 {offsets = [0, 24], sizes = [16, 8], strides = [1, 1]} : vector<16x32xf32> to vector<16x8xf32>
    %257 = vector.extract_strided_slice %256 {offsets = [0, 4], sizes = [16, 4], strides = [1, 1]} : vector<16x8xf32> to vector<16x4xf32>
    %cst_84 = arith.constant 0.000000e+00 : f32
    %258 = vector.broadcast %cst_84 : f32 to vector<16x4xf32>
    %259 = arith.subf %258, %257 : vector<16x4xf32>
    %260 = vector.extract_strided_slice %256 {offsets = [0, 0], sizes = [16, 4], strides = [1, 1]} : vector<16x8xf32> to vector<16x4xf32>
    %261 = tpu.concatenate %259, %260 in 1 : vector<16x4xf32>, vector<16x4xf32> -> vector<16x8xf32>
    %262 = arith.mulf %256, %1 : vector<16x8xf32>
    %263 = arith.mulf %261, %2 : vector<16x8xf32>
    %264 = arith.addf %262, %263 : vector<16x8xf32>
    "tpu.trace_start"() <{level = 10 : i32, message = "qd,kd->qk"}> : () -> ()
    %cst_85 = arith.constant dense<0.000000e+00> : vector<16x16xf32>
    %265 = tpu.matmul %264, %188, %cst_85 {dimension_numbers = #tpu.dot_dimension_numbers<[1], [1], [0], [0], [0, 0, 1, 0], [], []>} : vector<16x8xf32>, vector<16x8xf32>, vector<16x16xf32> -> vector<16x16xf32>
    "tpu.trace_stop"() : () -> ()
    %266 = arith.addf %265, %3 : vector<16x16xf32>
    %cst_86 = arith.constant dense<0xFF800000> : vector<16xf32>
    %267 = vector.multi_reduction <maximumf>, %266, %cst_86 [1] : vector<16x16xf32> to vector<16xf32>
    %268 = vector.shape_cast %267 : vector<16xf32> to vector<16x1xf32>
    %269 = vector.broadcast %268 : vector<16x1xf32> to vector<16x16xf32>
    %270 = arith.subf %266, %269 : vector<16x16xf32>
    %271 = math.exp %270 : vector<16x16xf32>
    %cst_87 = arith.constant dense<0.000000e+00> : vector<16xf32>
    %272 = vector.multi_reduction <add>, %271, %cst_87 [1] : vector<16x16xf32> to vector<16xf32>
    %273 = vector.shape_cast %272 : vector<16xf32> to vector<16x1xf32>
    %274 = tpu.reciprocal %273 {approx = true} : vector<16x1xf32> -> vector<16x1xf32>
    %275 = vector.broadcast %274 : vector<16x1xf32> to vector<16x16xf32>
    %276 = arith.mulf %271, %275 : vector<16x16xf32>
    %cst_88 = arith.constant dense<0.000000e+00> : vector<16x8xf32>
    %277 = tpu.matmul %276, %189, %cst_88 {dimension_numbers = #tpu.dot_dimension_numbers<[1], [0], [0], [1], [0, 0, 1, 1], [], []>} : vector<16x16xf32>, vector<16x8xf32>, vector<16x8xf32> -> vector<16x8xf32>
    %278 = tpu.concatenate %211, %233, %255, %277 in 1 : vector<16x8xf32>, vector<16x8xf32>, vector<16x8xf32>, vector<16x8xf32> -> vector<16x32xf32>
    %c1_89 = arith.constant 1 : index
    %c0_90 = arith.constant 0 : index
    %c0_91 = arith.constant 0 : index
    %279 = vector.load %arg7[%c1_89, %c0_90, %c0_91] : memref<2x32x32xf32, #tpu.memory_space<vmem>>, vector<1x32x32xf32>
    %280 = vector.shape_cast %279 : vector<1x32x32xf32> to vector<32x32xf32>
    %cst_92 = arith.constant dense<0.000000e+00> : vector<16x32xf32>
    %281 = tpu.matmul %278, %280, %cst_92 {dimension_numbers = #tpu.dot_dimension_numbers<[1], [0], [0], [1], [0, 0, 1, 1], [], []>} : vector<16x32xf32>, vector<32x32xf32>, vector<16x32xf32> -> vector<16x32xf32>
    %282 = arith.addf %161, %281 : vector<16x32xf32>
    %283 = arith.mulf %282, %282 : vector<16x32xf32>
    %cst_93 = arith.constant dense<0.000000e+00> : vector<16xf32>
    %284 = vector.multi_reduction <add>, %283, %cst_93 [1] : vector<16x32xf32> to vector<16xf32>
    %285 = vector.shape_cast %284 : vector<16xf32> to vector<16x1xf32>
    %cst_94 = arith.constant 3.200000e+01 : f32
    %286 = vector.broadcast %cst_94 : f32 to vector<16x1xf32>
    %287 = arith.divf %285, %286 : vector<16x1xf32>
    %cst_95 = arith.constant 9.99999997E-7 : f32
    %288 = vector.broadcast %cst_95 : f32 to vector<16x1xf32>
    %289 = arith.addf %287, %288 : vector<16x1xf32>
    %290 = math.rsqrt %289 : vector<16x1xf32>
    %291 = vector.broadcast %290 : vector<16x1xf32> to vector<16x32xf32>
    %292 = arith.mulf %282, %291 : vector<16x32xf32>
    %c1_96 = arith.constant 1 : index
    %c0_97 = arith.constant 0 : index
    %c0_98 = arith.constant 0 : index
    %293 = vector.load %arg5[%c1_96, %c0_97, %c0_98] : memref<2x1x32xf32, #tpu.memory_space<vmem>>, vector<1x1x32xf32>
    %294 = vector.shape_cast %293 : vector<1x1x32xf32> to vector<1x32xf32>
    %295 = vector.broadcast %294 : vector<1x32xf32> to vector<16x32xf32>
    %296 = arith.mulf %292, %295 : vector<16x32xf32>
    %c1_99 = arith.constant 1 : index
    %c0_100 = arith.constant 0 : index
    %c0_101 = arith.constant 0 : index
    %297 = vector.load %arg8[%c1_99, %c0_100, %c0_101] : memref<2x32x128xf32, #tpu.memory_space<vmem>>, vector<1x32x128xf32>
    %298 = vector.shape_cast %297 : vector<1x32x128xf32> to vector<32x128xf32>
    %cst_102 = arith.constant dense<0.000000e+00> : vector<16x128xf32>
    %299 = tpu.matmul %296, %298, %cst_102 {dimension_numbers = #tpu.dot_dimension_numbers<[1], [0], [0], [1], [0, 0, 1, 1], [], []>} : vector<16x32xf32>, vector<32x128xf32>, vector<16x128xf32> -> vector<16x128xf32>
    %300 = vector.extract_strided_slice %299 {offsets = [0, 0], sizes = [16, 64], strides = [1, 1]} : vector<16x128xf32> to vector<16x64xf32>
    %301 = vector.extract_strided_slice %299 {offsets = [0, 64], sizes = [16, 64], strides = [1, 1]} : vector<16x128xf32> to vector<16x64xf32>
    %cst_103 = arith.constant 5.000000e-01 : f32
    %302 = vector.broadcast %cst_103 : f32 to vector<16x64xf32>
    %303 = arith.mulf %302, %300 : vector<16x64xf32>
    %cst_104 = arith.constant 4.471500e-02 : f32
    %304 = vector.broadcast %cst_104 : f32 to vector<16x64xf32>
    %305 = arith.mulf %304, %300 : vector<16x64xf32>
    %306 = arith.mulf %305, %300 : vector<16x64xf32>
    %307 = arith.mulf %306, %300 : vector<16x64xf32>
    %308 = arith.addf %300, %307 : vector<16x64xf32>
    %cst_105 = arith.constant 0.797884583 : f32
    %309 = vector.broadcast %cst_105 : f32 to vector<16x64xf32>
    %310 = arith.mulf %309, %308 : vector<16x64xf32>
    %311 = math.tanh %310 : vector<16x64xf32>
    %cst_106 = arith.constant 1.000000e+00 : f32
    %312 = vector.broadcast %cst_106 : f32 to vector<16x64xf32>
    %313 = arith.addf %312, %311 : vector<16x64xf32>
    %314 = arith.mulf %303, %313 : vector<16x64xf32>
    %315 = arith.mulf %314, %301 : vector<16x64xf32>
    %c1_107 = arith.constant 1 : index
    %c0_108 = arith.constant 0 : index
    %c0_109 = arith.constant 0 : index
    %316 = vector.load %arg9[%c1_107, %c0_108, %c0_109] : memref<2x64x32xf32, #tpu.memory_space<vmem>>, vector<1x64x32xf32>
    %317 = vector.shape_cast %316 : vector<1x64x32xf32> to vector<64x32xf32>
    %cst_110 = arith.constant dense<0.000000e+00> : vector<16x32xf32>
    %318 = tpu.matmul %315, %317, %cst_110 {dimension_numbers = #tpu.dot_dimension_numbers<[1], [0], [0], [1], [0, 0, 1, 1], [], []>} : vector<16x64xf32>, vector<64x32xf32>, vector<16x32xf32> -> vector<16x32xf32>
    %319 = arith.addf %282, %318 : vector<16x32xf32>
    %320 = arith.mulf %319, %319 : vector<16x32xf32>
    %cst_111 = arith.constant dense<0.000000e+00> : vector<16xf32>
    %321 = vector.multi_reduction <add>, %320, %cst_111 [1] : vector<16x32xf32> to vector<16xf32>
    %322 = vector.shape_cast %321 : vector<16xf32> to vector<16x1xf32>
    %cst_112 = arith.constant 3.200000e+01 : f32
    %323 = vector.broadcast %cst_112 : f32 to vector<16x1xf32>
    %324 = arith.divf %322, %323 : vector<16x1xf32>
    %cst_113 = arith.constant 9.99999997E-7 : f32
    %325 = vector.broadcast %cst_113 : f32 to vector<16x1xf32>
    %326 = arith.addf %324, %325 : vector<16x1xf32>
    %327 = math.rsqrt %326 : vector<16x1xf32>
    %328 = vector.broadcast %327 : vector<16x1xf32> to vector<16x32xf32>
    %329 = arith.mulf %319, %328 : vector<16x32xf32>
    %c0_114 = arith.constant 0 : index
    %c0_115 = arith.constant 0 : index
    %330 = vector.load %arg10[%c0_114, %c0_115] : memref<1x32xf32, #tpu.memory_space<vmem>>, vector<1x32xf32>
    %331 = vector.broadcast %330 : vector<1x32xf32> to vector<16x32xf32>
    %332 = arith.mulf %329, %331 : vector<16x32xf32>
    %c0_116 = arith.constant 0 : index
    %c0_117 = arith.constant 0 : index
    %333 = vector.load %arg11[%c0_116, %c0_117] : memref<32x128xf32, #tpu.memory_space<vmem>>, vector<32x128xf32>
    %cst_118 = arith.constant dense<0.000000e+00> : vector<16x128xf32>
    %334 = tpu.matmul %332, %333, %cst_118 {dimension_numbers = #tpu.dot_dimension_numbers<[1], [0], [0], [1], [0, 0, 1, 1], [], []>} : vector<16x32xf32>, vector<32x128xf32>, vector<16x128xf32> -> vector<16x128xf32>
    %c0_119 = arith.constant 0 : index
    %c0_120 = arith.constant 0 : index
    %335 = vector.load %arg12[%c0_119, %c0_120] : memref<16x128xf32, #tpu.memory_space<vmem>>, vector<16x128xf32>
    tpu.vector_store %arg12[%c0_119, %c0_120], %334 {strides = array<i32>} : memref<16x128xf32, #tpu.memory_space<vmem>>, vector<16x128xf32>,
    return
  }
}

</mosaic_0001>

<bundles_post_ra>
// kernel: gemma_forward.1
= control target key start
LH: loop header
LB: loop body
LE: loop exit
PB: predicated region body
PF: predicated region fallthrough
CT: control target
= control target key end

     0   :  { %vm51_vm0 = vcmask 261120   ;;  %s3480_s16 = smov 100   ;;  %s3481_s17 = smov 92   ;;  %vm179_vm1 = vcmask 31744   ;;  %vm230_vm2 = vcmask 64512   ;;  %vm316_vm3 = vcmask 130048   ;;  %s4326_s0 = inlined_call_operand.vmem [shape: f32[16,32], index: 0, kind: input, shape index: {}]   ;;  %s4327_s6 = inlined_call_operand.vmem [shape: f32[2,32,48], index: 6, kind: input, shape index: {}]   ;;  %s4328_s4 = inlined_call_operand.vmem [shape: f32[2,1,32], index: 4, kind: input, shape index: {}]   ;;  %s4329_s1 = inlined_call_operand.vmem [shape: f32[16,8], index: 1, kind: input, shape index: {}]   ;;  %s4330_s2 = inlined_call_operand.vmem [shape: f32[16,8], index: 2, kind: input, shape index: {}]   ;;  %s4331_s3 = inlined_call_operand.vmem [shape: f32[16,16], index: 3, kind: input, shape index: {}]   ;;  %s4332_s7 = inlined_call_operand.vmem [shape: f32[2,32,32], index: 7, kind: input, shape index: {}]   ;;  %s4333_s8 = inlined_call_operand.vmem [shape: f32[2,32,128], index: 8, kind: input, shape index: {}]   ;;  %s4334_s5 = inlined_call_operand.vmem [shape: f32[2,1,32], index: 5, kind: input, shape index: {}]   ;;  %s4335_s9 = inlined_call_operand.vmem [shape: f32[2,64,32], index: 9, kind: input, shape index: {}]   ;;  %s4336_s11 = inlined_call_operand.vmem [shape: f32[32,128], index: 11, kind: input, shape index: {}]   ;;  %s4337_s10 = inlined_call_operand.vmem [shape: f32[1,32], index: 10, kind: input, shape index: {}]   ;;  %s4338_s12 = inlined_call_operand.vmem [shape: f32[16,128], index: 12, kind: output, shape index: {}]  }
   0x1   :  { %v3564_v0 = vld [vmem:[%s4326_s0] sm:$0xff]  ;;  %v3569_v1 = vld [vmem:[%s4326_s0 + $0x8] sm:$0xff]  ;;  %v79_v6 = vld [vmem:[%s4327_s6 + $0x18] sm:$0xff]  ;;  %s3482_s18 = smov 124   ;;  %s3483_s21 = smov 32   ;;  %vm1120_vm4 = vcmask 195584  }
   0x2   :  { %v49_v2 = vmul.f32 %v3564_v0, %v3564_v0  ;;  %v50_v3 = vmul.f32 %v3569_v1, %v3569_v1  ;;  %v78_v7 = vld [vmem:[%s4327_s6 + $0x10] sm:$0xff]  ;;  %3139 = vmatprep.subr.mxu0 %v79_v6  ;;  %v77_v8 = vld [vmem:[%s4327_s6 + $0x8] sm:$0xff]  ;;  %v76_v9 = vld [vmem:[%s4327_s6] sm:$0xff]  ;;  %s3484_s28 = smov 4   ;;  %s3485_s0 = smov 96   ;;  %vm1356_vm5 = vcmask 523264  }
   0x3   :  { %3140 = vmatpush3.msra.mxu0 %v79_v6  ;;  %v2920_v17 = vld [vmem:[%s4328_s4] ss:$0 sm:$0xff]  ;;  %v3619_v27 = vld [vmem:[%s4329_s1 + $0x8] sm:$0xff]  ;;  %s3486_s29 = smov 116   ;;  %s3487_s19 = smov 8  }
   0x4   :  { %v52_v4 = vsel %vm51_vm0, %v49_v2, 0.0  ;;  %v55_v5 = vsel %vm51_vm0, %v50_v3, 0.0  ;;  %3141 = vmatprep.subr.mxu0 %v78_v7  ;;  %v3628_v28 = vld [vmem:[%s4329_s1] sm:$0xff]  ;;  %v3635_v30 = vld [vmem:[%s4330_s2 + $0x8] sm:$0xff]  ;;  %s4343_s20 = smov 88   ;;  %s3489_s22 = smov 120  }
   0x5   :  { %53 = vadd.xlane.f32.xlu0 %v52_v4  ;;  %3142 = vmatpush3.msra.mxu0 %v78_v7  ;;  %v3642_v34 = vld [vmem:[%s4330_s2] sm:$0xff]  ;;  %v3691_v61 = vld [vmem:[%s4331_s3 + $0x8] sm:$0xff]  ;;  %s3490_s23 = smov 108   ;;  %s4345_s24 = smov 16  }
   0x6   :  { %3143 = vmatprep.subr.mxu0 %v77_v8  ;;  %v3696_v63 = vld [vmem:[%s4331_s3] sm:$0xff]  ;;  %s4341_s25 = smov 112   ;;  %s3493_s26 = smov 24  }
   0x7   :  { %3144 = vmatpush3.msra.mxu0 %v77_v8  ;;  %s4339_s27 = smov 104   ;;  %s4351_s14 = smov 112  }
   0x8   :  { %3145 = vmatprep.subr.mxu0 %v76_v9 }
   0x9   :  { %56 = vadd.xlane.f32.xlu0 %v55_v5  ;;  %3146 = vmatpush3.msra.mxu0 %v76_v9 }
  0x8e   :  { %v54_v10 = vpop.xlane.xlu0 %53 }
  0x8f   :  { %v59_v11 = vmul.f32 0.03125, %v54_v10 }
  0x91   :  { %v61_v12 = vadd.f32 1e-06, %v59_v11 }
  0x92   :  { %v57_v13 = vpop.xlane.xlu0 %56 }
  0x93   :  { %3382 = vrsqrt.f32 %v61_v12  ;;  %v60_v14 = vmul.f32 0.03125, %v57_v13 }
  0x95   :  { %v62_v15 = vadd.f32 1e-06, %v60_v14 }
  0x97   :  { %3384 = vrsqrt.f32 %v62_v15 }
  0xa0   :  { %v3383_v16 = vpop.eup %3382 }
  0xa1   :  { %v65_v18 = vmul.f32 %v3383_v16, %v3564_v0 }
  0xa3   :  { %v74_v19 = vmul.f32 %v2920_v17, %v65_v18 }
  0xa4   :  { %v3385_v20 = vpop.eup %3384 }
  0xa5   :  { %v66_v21 = vmul.f32 %v3385_v20, %v3569_v1  ;;  %3147 = vmatprep.mubr.msk.f32.mxu0 %vm51_vm0, %v74_v19 }
  0xa7   :  { %v75_v22 = vmul.f32 %v2920_v17, %v66_v21 }
  0xa9   :  { %3148 = vmatmul.mubr.msk.f32.vlgmr.msra.gmra.mxu0 %vm51_vm0, %v75_v22 }
 0x169   :  { %v3596_v23 = vpop.f32.mrf.mxu0 }
 0x16a   :  { %175 = vrot.lane.b32.xlu1 %v3596_v23, %s3480_s16  ;;  %v3603_v25 = vsub.f32 0.0, %v3596_v23  ;;  %v219_v58 = vmul.f32 %v3596_v23, %v3619_v27 }
 0x16b   :  { %v3600_v24 = vpop.f32.mrf.mxu0 }
 0x16c   :  { %v3606_v26 = vsub.f32 0.0, %v3600_v24  ;;  %v218_v51 = vmul.f32 %v3600_v24, %v3628_v28 }
 0x16e   :  { %167 = vrot.lane.b32.xlu1 %v3603_v25, %s3481_s17  ;;  %165 = vrot.lane.b32.xlu0 %v3606_v26, %s3481_s17 }
 0x172   :  { %173 = vrot.lane.b32.xlu1 %v3600_v24, %s3480_s16  ;;  %204 = vrot.lane.b32.xlu0 %v3606_v26, %s3482_s18 }
 0x176   :  { %186 = vrot.lane.b32.xlu1 %v3619_v27, %s3483_s21  ;;  %206 = vrot.lane.b32.xlu0 %v3603_v25, %s3482_s18 }
 0x17a   :  { %184 = vrot.lane.b32.xlu1 %v3628_v28, %s3483_s21 }
 0x1dc   :  { %v176_v29 = vpop.permute.xlu1 %175 }
 0x1e0   :  { %v168_v31 = vpop.permute.xlu1 %167  ;;  %v166_v35 = vpop.permute.xlu0 %165 }
 0x1e1   :  { %v181_v32 = vsel %vm179_vm1, %v168_v31, %v176_v29 }
 0x1e2   :  { %v193_v33 = vmul.f32 %v181_v32, %v3635_v30 }
 0x1e4   :  { %198 = vrot.lane.b32.xlu1 %v193_v33, %s3483_s21  ;;  %v174_v36 = vpop.permute.xlu1 %173  ;;  %v205_v47 = vpop.permute.xlu0 %204 }
 0x1e5   :  { %v180_v37 = vsel %vm179_vm1, %v166_v35, %v174_v36 }
 0x1e6   :  { %v192_v38 = vmul.f32 %v180_v37, %v3642_v34 }
 0x1e8   :  { %196 = vrot.lane.b32.xlu1 %v192_v38, %s3483_s21  ;;  %v3650_v39 = vpop.permute.xlu1 %186  ;;  %v207_v53 = vpop.permute.xlu0 %206 }
 0x1e9   :  { %v191_v41 = vmul.f32 %v3596_v23, %v3650_v39 }
 0x1ec   :  { %210 = vrot.lane.b32.xlu1 %v3600_v24, %s3484_s28  ;;  %v3652_v40 = vpop.permute.xlu1 %184 }
 0x1ed   :  { %v190_v44 = vmul.f32 %v3652_v40, %v3600_v24 }
 0x256   :  { %v199_v42 = vpop.permute.xlu1 %198 }
 0x257   :  { %v203_v43 = vadd.f32 %v199_v42, %v191_v41 }
 0x259   :  { %228 = vrot.lane.b32.xlu1 %v203_v43, %s3485_s0 }
 0x25a   :  { %v197_v45 = vpop.permute.xlu1 %196 }
 0x25b   :  { %v202_v46 = vadd.f32 %v197_v45, %v190_v44 }
 0x25d   :  { %212 = vrot.lane.b32.xlu1 %v3596_v23, %s3484_s28  ;;  %226 = vrot.lane.b32.xlu0 %v202_v46, %s3485_s0 }
 0x25e   :  { %v211_v48 = vpop.permute.xlu1 %210 }
 0x25f   :  { %v216_v49 = vsel %vm179_vm1, %v205_v47, %v211_v48 }
 0x260   :  { %v220_v50 = vmul.f32 %v216_v49, %v3642_v34 }
 0x261   :  { %432 = vrot.lane.b32.xlu1 %v3600_v24, %s3482_s18  ;;  %426 = vrot.lane.b32.xlu0 %v3606_v26, %s3486_s29 }
 0x262   :  { %v222_v52 = vadd.f32 %v220_v50, %v218_v51 }
 0x264   :  { %3154 = vmatprep.mubr.msk.f32.mxu1 %vm230_vm2, %v222_v52 }
 0x2cb   :  { %v3671_v54 = vpop.permute.xlu1 %228 }
 0x2cc   :  { %3150 = vmatprep.subr.msk.mxu1 %vm230_vm2, %v3671_v54 }
 0x2cd   :  { %3151 = vmatpush3.xpose.msk.msra.mxu1 %vm230_vm2, %v3671_v54 }
 0x2cf   :  { %v213_v55 = vpop.permute.xlu1 %212  ;;  %v3677_v56 = vpop.permute.xlu0 %226 }
 0x2d0   :  { %v217_v57 = vsel %vm179_vm1, %v207_v53, %v213_v55  ;;  %3152 = vmatprep.subr.msk.mxu1 %vm230_vm2, %v3677_v56 }
 0x2d1   :  { %v221_v59 = vmul.f32 %v217_v57, %v3635_v30  ;;  %3153 = vmatpush3.xpose.msk.msra.mxu1 %vm230_vm2, %v3677_v56 }
 0x2d3   :  { %v223_v60 = vadd.f32 %v221_v59, %v219_v58  ;;  %v433_v7 = vpop.permute.xlu1 %432  ;;  %v427_v8 = vpop.permute.xlu0 %426 }
 0x2d4   :  { %v438_v9 = vsel %vm179_vm1, %v427_v8, %v433_v7 }
 0x2d5   :  { %3155 = vmatmul.mubr.msk.f32.vlgmr.msra.gmra.mxu1 %vm230_vm2, %v223_v60  ;;  %v448_v10 = vmul.f32 %v438_v9, %v3642_v34 }
 0x395   :  { %v3156_v62 = vpop.f32.mrf.mxu1 }
 0x396   :  { %v313_v2 = vadd.f32 %v3156_v62, %v3691_v61 }
 0x397   :  { %v307_v3 = vpop.f32.mrf.mxu1 }
 0x398   :  { %v308_v4 = vadd.f32 %v307_v3, %v3696_v63  ;;  %v320_v5 = vsel %vm316_vm3, %v313_v2, -inf }
 0x399   :  { %321 = vmax.xlane.f32.xlu0 %v320_v5 }
 0x39a   :  { %v317_v6 = vsel %vm316_vm3, %v308_v4, -inf }
 0x39b   :  { %318 = vmax.xlane.f32.xlu1 %v317_v6 }
 0x3ac   :  { %428 = vrot.lane.b32.xlu1 %v3603_v25, %s3486_s29 }
 0x3af   :  { %434 = vrot.lane.b32.xlu0 %v3596_v23, %s3482_s18 }
 0x3b0   :  { %440 = vrot.lane.b32.xlu1 %v3628_v28, %s3487_s19 }
 0x3b3   :  { %442 = vrot.lane.b32.xlu0 %v3619_v27, %s3487_s19 }
 0x3b4   :  { %452 = vrot.lane.b32.xlu1 %v448_v10, %s3487_s19 }
 0x3b8   :  { %339 = vrot.lane.b32.xlu1 %v3600_v24, %s4343_s20 }
 0x422   :  { %v322_v11 = vpop.xlane.xlu0 %321 }
 0x423   :  { %v324_v19 = vsub.f32 %v313_v2, %v322_v11 }
 0x424   :  { %v319_v12 = vpop.xlane.xlu1 %318 }
 0x425   :  { %v323_v13 = vsub.f32 %v308_v4, %v319_v12  ;;  %v327_v21 = vmul.f32 1.442695, %v324_v19 }
 0x426   :  { %v435_v15 = vpop.permute.xlu0 %434 }
 0x427   :  { %v325_v14 = vmul.f32 1.442695, %v323_v13 }
 0x428   :  { %v429_v16 = vpop.permute.xlu1 %428 }
 0x429   :  { %3386 = vpow2.f32 %v325_v14  ;;  %v439_v17 = vsel %vm179_vm1, %v429_v16, %v435_v15 }
 0x42a   :  { %v449_v18 = vmul.f32 %v439_v17, %v3635_v30  ;;  %3388 = vpow2.f32 %v327_v21  ;;  %v3729_v37 = vpop.permute.xlu0 %442 }
 0x42b   :  { %v447_v38 = vmul.f32 %v3596_v23, %v3729_v37 }
 0x42c   :  { %454 = vrot.lane.b32.xlu0 %v449_v18, %s3487_s19  ;;  %v3719_v29 = vpop.permute.xlu1 %440 }
 0x42d   :  { %v446_v32 = vmul.f32 %v3719_v29, %v3600_v24 }
 0x430   :  { %v453_v31 = vpop.permute.xlu1 %452 }
 0x431   :  { %v458_v35 = vadd.f32 %v453_v31, %v446_v32 }
 0x434   :  { %v3736_v43 = vpop.permute.xlu1 %339 }
 0x436   :  { %v3387_v20 = vpop.eup %3386 }
 0x437   :  { %v329_v22 = vsel %vm316_vm3, %v3387_v20, 0.0  ;;  %v3389_v33 = vpop.eup %3388 }
 0x438   :  { %330 = vadd.xlane.f32.xlu1 %v329_v22  ;;  %v332_v36 = vsel %vm316_vm3, %v3389_v33, 0.0 }
 0x449   :  { %462 = vrot.lane.b32.xlu1 %v458_v35, %s3489_s22 }
 0x44b   :  { %333 = vadd.xlane.f32.xlu0 %v332_v36 }
 0x44d   :  { %654 = vrot.lane.b32.xlu1 %v3600_v24, %s3486_s29 }
 0x461   :  { %341 = vrot.lane.b32.xlu0 %v3596_v23, %s4343_s20 }
 0x49e   :  { %v455_v41 = vpop.permute.xlu0 %454 }
 0x49f   :  { %v459_v42 = vadd.f32 %v455_v41, %v447_v38 }
 0x4a1   :  { %464 = vrot.lane.b32.xlu0 %v459_v42, %s3489_s22 }
 0x4a5   :  { %648 = vrot.lane.b32.xlu0 %v3606_v26, %s3490_s23 }
 0x4c1   :  { %v331_v44 = vpop.xlane.xlu1 %330 }
 0x4c2   :  { %3390 = vrcp.f32 %v331_v44 }
 0x4c5   :  { %v463_v51 = vpop.permute.xlu1 %462 }
 0x4c9   :  { %v655_v4 = vpop.permute.xlu1 %654 }
 0x4cf   :  { %v3391_v45 = vpop.eup %3390 }
 0x4d0   :  { %v337_v46 = vmul.f32 %v3391_v45, %v3387_v20 }
 0x4d2   :  { %3161 = vmatprep.mubr.msk.f32.mxu1 %vm316_vm3, %v337_v46 }
 0x4d4   :  { %v334_v47 = vpop.xlane.xlu0 %333 }
 0x4d5   :  { %3392 = vrcp.f32 %v334_v47 }
 0x4d8   :  { %v3739_v48 = vpop.permute.xlu0 %341 }
 0x4d9   :  { %3157 = vmatprep.subr.mxu1 %v3739_v48  ;;  %3171 = vmatprep.subr.mxu0 %v3739_v48 }
 0x4da   :  { %3158 = vmatpush3.msra.mxu1 %v3739_v48  ;;  %3172 = vmatpush3.msra.mxu0 %v3739_v48 }
 0x4db   :  { %3159 = vmatprep.subr.mxu1 %v3736_v43  ;;  %3173 = vmatprep.subr.mxu0 %v3736_v43 }
 0x4dc   :  { %3160 = vmatpush3.msra.mxu1 %v3736_v43  ;;  %3174 = vmatpush3.msra.mxu0 %v3736_v43 }
 0x4dd   :  { %3164 = vmatprep.subr.msk.mxu1 %vm230_vm2, %v3671_v54  ;;  %3178 = vmatprep.subr.msk.mxu0 %vm230_vm2, %v3671_v54 }
 0x4e2   :  { %v3393_v49 = vpop.eup %3392 }
 0x4e3   :  { %v338_v50 = vmul.f32 %v3393_v49, %v3389_v33 }
 0x4e5   :  { %3162 = vmatmul.mubr.msk.f32.vlgmr.msra.gmra.mxu1 %vm316_vm3, %v338_v50 }
 0x4e6   :  { %3165 = vmatpush3.xpose.msk.msra.mxu1 %vm230_vm2, %v3671_v54  ;;  %3168 = vmatprep.mubr.msk.f32.mxu1 %vm230_vm2, %v463_v51 }
 0x4e7   :  { %3166 = vmatprep.subr.msk.mxu1 %vm230_vm2, %v3677_v56 }
 0x4ea   :  { %3167 = vmatpush3.xpose.msk.msra.mxu1 %vm230_vm2, %v3677_v56 }
 0x4eb   :  { %3185 = vmatprep.subr.mxu1 %v3739_v48 }
 0x513   :  { %v465_v52 = vpop.permute.xlu0 %464 }
 0x514   :  { %3169 = vmatmul.mubr.msk.f32.vlgmr.msra.gmra.mxu1 %vm230_vm2, %v465_v52 }
 0x515   :  { %3186 = vmatpush3.msra.mxu1 %v3739_v48 }
 0x516   :  { %3187 = vmatprep.subr.mxu1 %v3736_v43 }
 0x517   :  { %3188 = vmatpush3.msra.mxu1 %v3736_v43  ;;  %v649_v3 = vpop.permute.xlu0 %648 }
 0x518   :  { %3192 = vmatprep.subr.msk.mxu1 %vm230_vm2, %v3671_v54  ;;  %v660_v5 = vsel %vm179_vm1, %v649_v3, %v655_v4 }
 0x519   :  { %v670_v6 = vmul.f32 %v660_v5, %v3642_v34 }
 0x5a5   :  { %v3768_v53 = vpop.f32.mrf.mxu1 }
 0x5a7   :  { %v3770_v55 = vpop.f32.mrf.mxu1 }
 0x5d4   :  { %v3170_v57 = vpop.f32.mrf.mxu1 }
 0x5d5   :  { %v542_v58 = vadd.f32 %v3170_v57, %v3691_v61 }
 0x5d6   :  { %v536_v59 = vpop.f32.mrf.mxu1 }
 0x5d7   :  { %v537_v60 = vadd.f32 %v536_v59, %v3696_v63  ;;  %v548_v62 = vsel %vm316_vm3, %v542_v58, -inf }
 0x5d8   :  { %549 = vmax.xlane.f32.xlu0 %v548_v62 }
 0x5d9   :  { %v545_v2 = vsel %vm316_vm3, %v537_v60, -inf }
 0x5da   :  { %546 = vmax.xlane.f32.xlu1 %v545_v2 }
 0x5eb   :  { %650 = vrot.lane.b32.xlu1 %v3603_v25, %s3490_s23 }
 0x5ee   :  { %656 = vrot.lane.b32.xlu0 %v3596_v23, %s3486_s29 }
 0x5ef   :  { %662 = vrot.lane.b32.xlu1 %v3628_v28, %s4345_s24 }
 0x5f2   :  { %664 = vrot.lane.b32.xlu0 %v3619_v27, %s4345_s24 }
 0x5f3   :  { %674 = vrot.lane.b32.xlu1 %v670_v6, %s4345_s24 }
 0x661   :  { %v550_v7 = vpop.xlane.xlu0 %549 }
 0x662   :  { %v552_v15 = vsub.f32 %v542_v58, %v550_v7 }
 0x663   :  { %v547_v8 = vpop.xlane.xlu1 %546 }
 0x664   :  { %v551_v9 = vsub.f32 %v537_v60, %v547_v8  ;;  %v555_v17 = vmul.f32 1.442695, %v552_v15 }
 0x665   :  { %v657_v11 = vpop.permute.xlu0 %656 }
 0x666   :  { %v553_v10 = vmul.f32 1.442695, %v551_v9 }
 0x667   :  { %v651_v12 = vpop.permute.xlu1 %650 }
 0x668   :  { %3394 = vpow2.f32 %v553_v10  ;;  %v661_v13 = vsel %vm179_vm1, %v651_v12, %v657_v11 }
 0x669   :  { %v671_v14 = vmul.f32 %v661_v13, %v3635_v30  ;;  %3396 = vpow2.f32 %v555_v17  ;;  %v3799_v33 = vpop.permute.xlu0 %664 }
 0x66a   :  { %v669_v35 = vmul.f32 %v3596_v23, %v3799_v33 }
 0x66b   :  { %676 = vrot.lane.b32.xlu0 %v671_v14, %s4345_s24  ;;  %v3792_v21 = vpop.permute.xlu1 %662 }
 0x66c   :  { %v668_v31 = vmul.f32 %v3792_v21, %v3600_v24 }
 0x66f   :  { %v675_v22 = vpop.permute.xlu1 %674 }
 0x670   :  { %v680_v32 = vadd.f32 %v675_v22, %v668_v31 }
 0x675   :  { %v3395_v16 = vpop.eup %3394 }
 0x676   :  { %v557_v18 = vsel %vm316_vm3, %v3395_v16, 0.0  ;;  %v3397_v19 = vpop.eup %3396 }
 0x677   :  { %558 = vadd.xlane.f32.xlu1 %v557_v18  ;;  %v560_v20 = vsel %vm316_vm3, %v3397_v19, 0.0 }
 0x68a   :  { %561 = vadd.xlane.f32.xlu0 %v560_v20 }
 0x6a0   :  { %684 = vrot.lane.b32.xlu0 %v680_v32, %s4341_s25 }
 0x6a4   :  { %870 = vrot.lane.b32.xlu0 %v3606_v26, %s3480_s16 }
 0x6dd   :  { %v677_v36 = vpop.permute.xlu0 %676 }
 0x6de   :  { %v681_v38 = vadd.f32 %v677_v36, %v669_v35 }
 0x6e0   :  { %686 = vrot.lane.b32.xlu1 %v681_v38, %s4341_s25  ;;  %s4347_s25 = smov 64  }
 0x6e4   :  { %876 = vrot.lane.b32.xlu1 %v3600_v24, %s3490_s23 }
 0x700   :  { %v559_v41 = vpop.xlane.xlu1 %558 }
 0x701   :  { %3398 = vrcp.f32 %v559_v41 }
 0x70e   :  { %v3399_v42 = vpop.eup %3398 }
 0x70f   :  { %v565_v44 = vmul.f32 %v3399_v42, %v3395_v16 }
 0x711   :  { %3175 = vmatprep.mubr.msk.f32.mxu0 %vm316_vm3, %v565_v44 }
 0x713   :  { %v562_v45 = vpop.xlane.xlu0 %561 }
 0x714   :  { %3400 = vrcp.f32 %v562_v45 }
 0x717   :  { %v685_v47 = vpop.permute.xlu0 %684 }
 0x721   :  { %v3401_v26 = vpop.eup %3400 }
 0x722   :  { %v566_v46 = vmul.f32 %v3401_v26, %v3397_v19 }
 0x724   :  { %3176 = vmatmul.mubr.msk.f32.vlgmr.msra.gmra.mxu0 %vm316_vm3, %v566_v46 }
 0x725   :  { %3179 = vmatpush3.xpose.msk.msra.mxu0 %vm230_vm2, %v3671_v54  ;;  %3182 = vmatprep.mubr.msk.f32.mxu0 %vm230_vm2, %v685_v47 }
 0x726   :  { %3180 = vmatprep.subr.msk.mxu0 %vm230_vm2, %v3677_v56 }
 0x729   :  { %3181 = vmatpush3.xpose.msk.msra.mxu0 %vm230_vm2, %v3677_v56 }
 0x72a   :  { %3199 = vmatprep.subr.mxu0 %v3739_v48 }
 0x752   :  { %v687_v49 = vpop.permute.xlu1 %686 }
 0x753   :  { %3183 = vmatmul.mubr.msk.f32.vlgmr.msra.gmra.mxu0 %vm230_vm2, %v687_v49 }
 0x754   :  { %3200 = vmatpush3.msra.mxu0 %v3739_v48 }
 0x755   :  { %3201 = vmatprep.subr.mxu0 %v3736_v43 }
 0x756   :  { %3202 = vmatpush3.msra.mxu0 %v3736_v43  ;;  %v877_v48 = vpop.permute.xlu1 %876  ;;  %v871_v43 = vpop.permute.xlu0 %870 }
 0x757   :  { %v882_v2 = vsel %vm179_vm1, %v871_v43, %v877_v48 }
 0x758   :  { %v892_v3 = vmul.f32 %v882_v2, %v3642_v34 }
 0x7e4   :  { %v3820_v50 = vpop.f32.mrf.mxu0 }
 0x7e6   :  { %v3822_v51 = vpop.f32.mrf.mxu0 }
 0x813   :  { %v3184_v52 = vpop.f32.mrf.mxu0 }
 0x814   :  { %v764_v57 = vadd.f32 %v3184_v52, %v3691_v61 }
 0x815   :  { %v758_v58 = vpop.f32.mrf.mxu0 }
 0x816   :  { %v759_v59 = vadd.f32 %v758_v58, %v3696_v63  ;;  %v770_v60 = vsel %vm316_vm3, %v764_v57, -inf }
 0x817   :  { %771 = vmax.xlane.f32.xlu0 %v770_v60 }
 0x818   :  { %v767_v62 = vsel %vm316_vm3, %v759_v59, -inf }
 0x819   :  { %768 = vmax.xlane.f32.xlu1 %v767_v62 }
 0x82a   :  { %872 = vrot.lane.b32.xlu1 %v3603_v25, %s3480_s16 }
 0x82d   :  { %878 = vrot.lane.b32.xlu0 %v3596_v23, %s3490_s23 }
 0x82e   :  { %884 = vrot.lane.b32.xlu1 %v3628_v28, %s3493_s26 }
 0x831   :  { %886 = vrot.lane.b32.xlu0 %v3619_v27, %s3493_s26 }
 0x832   :  { %896 = vrot.lane.b32.xlu1 %v892_v3, %s3493_s26 }
 0x8a0   :  { %v772_v4 = vpop.xlane.xlu0 %771 }
 0x8a1   :  { %v774_v28 = vsub.f32 %v764_v57, %v772_v4 }
 0x8a2   :  { %v769_v5 = vpop.xlane.xlu1 %768 }
 0x8a3   :  { %v773_v25 = vsub.f32 %v759_v59, %v769_v5  ;;  %v777_v12 = vmul.f32 1.442695, %v774_v28 }
 0x8a4   :  { %v879_v7 = vpop.permute.xlu0 %878 }
 0x8a5   :  { %v775_v6 = vmul.f32 1.442695, %v773_v25 }
 0x8a6   :  { %v873_v8 = vpop.permute.xlu1 %872 }
 0x8a7   :  { %3402 = vpow2.f32 %v775_v6  ;;  %v883_v9 = vsel %vm179_vm1, %v873_v8, %v879_v7  ;;  %v1124_v7 = vld [vmem:[%s4332_s7 + $0x8] sm:$0xff]  ;;  %v1123_v8 = vld [vmem:[%s4332_s7] sm:$0xff] }
 0x8a8   :  { %v893_v10 = vmul.f32 %v883_v9, %v3635_v30  ;;  %3404 = vpow2.f32 %v777_v12  ;;  %v3849_v19 = vpop.permute.xlu0 %886 }
 0x8a9   :  { %v891_v20 = vmul.f32 %v3596_v23, %v3849_v19 }
 0x8aa   :  { %898 = vrot.lane.b32.xlu0 %v893_v10, %s3493_s26  ;;  %v3844_v15 = vpop.permute.xlu1 %884 }
 0x8ab   :  { %v890_v17 = vmul.f32 %v3844_v15, %v3600_v24 }
 0x8ae   :  { %v897_v16 = vpop.permute.xlu1 %896 }
 0x8af   :  { %v902_v18 = vadd.f32 %v897_v16, %v890_v17 }
 0x8b4   :  { %v3403_v11 = vpop.eup %3402 }
 0x8b5   :  { %v779_v27 = vsel %vm316_vm3, %v3403_v11, 0.0  ;;  %v3405_v13 = vpop.eup %3404 }
 0x8b6   :  { %780 = vadd.xlane.f32.xlu1 %v779_v27  ;;  %v782_v14 = vsel %vm316_vm3, %v3405_v13, 0.0 }
 0x8c9   :  { %783 = vadd.xlane.f32.xlu0 %v782_v14 }
 0x8df   :  { %906 = vrot.lane.b32.xlu0 %v902_v18, %s4339_s27 }
 0x91c   :  { %v899_v22 = vpop.permute.xlu0 %898 }
 0x91d   :  { %v903_v31 = vadd.f32 %v899_v22, %v891_v20 }
 0x91f   :  { %908 = vrot.lane.b32.xlu1 %v903_v31, %s4339_s27 }
 0x93f   :  { %v781_v32 = vpop.xlane.xlu1 %780 }
 0x940   :  { %3406 = vrcp.f32 %v781_v32 }
 0x94d   :  { %v3407_v35 = vpop.eup %3406 }
 0x94e   :  { %v787_v36 = vmul.f32 %v3407_v35, %v3403_v11 }
 0x950   :  { %3189 = vmatprep.mubr.msk.f32.mxu1 %vm316_vm3, %v787_v36 }
 0x952   :  { %v784_v24 = vpop.xlane.xlu0 %783 }
 0x953   :  { %3408 = vrcp.f32 %v784_v24 }
 0x956   :  { %v907_v42 = vpop.permute.xlu0 %906 }
 0x960   :  { %v3409_v38 = vpop.eup %3408 }
 0x961   :  { %v788_v41 = vmul.f32 %v3409_v38, %v3405_v13 }
 0x963   :  { %3190 = vmatmul.mubr.msk.f32.vlgmr.msra.gmra.mxu1 %vm316_vm3, %v788_v41 }
 0x964   :  { %3193 = vmatpush3.xpose.msk.msra.mxu1 %vm230_vm2, %v3671_v54  ;;  %3196 = vmatprep.mubr.msk.f32.mxu1 %vm230_vm2, %v907_v42  ;;  %v1236_v42 = vld [vmem:[%s4333_s8 + $0x8] sm:$0xff] }
 0x965   :  { %3194 = vmatprep.subr.msk.mxu1 %vm230_vm2, %v3677_v56 }
 0x968   :  { %3195 = vmatpush3.xpose.msk.msra.mxu1 %vm230_vm2, %v3677_v56 }
 0x991   :  { %v909_v23 = vpop.permute.xlu1 %908 }
 0x992   :  { %3197 = vmatmul.mubr.msk.f32.vlgmr.msra.gmra.mxu1 %vm230_vm2, %v909_v23  ;;  %v1235_v23 = vld [vmem:[%s4333_s8] sm:$0xff] }
 0xa23   :  { %v3191_v44 = vpop.f32.mrf.mxu1 }
 0xa25   :  { %v861_v45 = vpop.f32.mrf.mxu1 }
 0xa52   :  { %v3198_v26 = vpop.f32.mrf.mxu1 }
 0xa53   :  { %v986_v46 = vadd.f32 %v3198_v26, %v3691_v61 }
 0xa54   :  { %v980_v47 = vpop.f32.mrf.mxu1 }
 0xa55   :  { %v981_v49 = vadd.f32 %v980_v47, %v3696_v63  ;;  %v992_v54 = vsel %vm316_vm3, %v986_v46, -inf }
 0xa56   :  { %993 = vmax.xlane.f32.xlu0 %v992_v54 }
 0xa57   :  { %v989_v52 = vsel %vm316_vm3, %v981_v49, -inf }
 0xa58   :  { %990 = vmax.xlane.f32.xlu1 %v989_v52 }
 0xadf   :  { %v994_v57 = vpop.xlane.xlu0 %993 }
 0xae0   :  { %v996_v58 = vsub.f32 %v986_v46, %v994_v57 }
 0xae1   :  { %v991_v56 = vpop.xlane.xlu1 %990 }
 0xae2   :  { %v999_v59 = vmul.f32 1.442695, %v996_v58  ;;  %v995_v60 = vsub.f32 %v981_v49, %v991_v56  ;;  %v2949_v56 = vld [vmem:[%s4334_s5] ss:$0 sm:$0xff] }
 0xae4   :  { %3410 = vpow2.f32 %v999_v59  ;;  %v997_v62 = vmul.f32 1.442695, %v995_v60 }
 0xae6   :  { %3412 = vpow2.f32 %v997_v62  ;;  %v1355_v62 = vld [vmem:[%s4335_s9 + $0x38] sm:$0xff] }
 0xaf1   :  { %v3411_v48 = vpop.eup %3410 }
 0xaf2   :  { %v1004_v61 = vsel %vm316_vm3, %v3411_v48, 0.0 }
 0xaf3   :  { %v3413_v43 = vpop.eup %3412  ;;  %1005 = vadd.xlane.f32.xlu1 %v1004_v61  ;;  %v1353_v61 = vld [vmem:[%s4335_s9 + $0x28] sm:$0xff] }
 0xaf4   :  { %v1001_v63 = vsel %vm316_vm3, %v3413_v43, 0.0 }
 0xaf5   :  { %1002 = vadd.xlane.f32.xlu0 %v1001_v63  ;;  %v1351_v63 = vld [vmem:[%s4335_s9 + $0x18] sm:$0xff] }
 0xb04   :  { %1096 = vrot.lane.b32.xlu1 %v3820_v50, %s3487_s19  ;;  %v1126_v50 = vld [vmem:[%s4332_s7 + $0x18] sm:$0xff] }
 0xb05   :  { %3206 = vmatprep.subr.mxu0 %v1126_v50 }
 0xb08   :  { %1102 = vrot.lane.b32.xlu1 %v861_v45, %s4345_s24 }
 0xb0b   :  { %1094 = vrot.lane.b32.xlu0 %v3822_v51, %s3487_s19  ;;  %v1125_v51 = vld [vmem:[%s4332_s7 + $0x10] sm:$0xff] }
 0xb0f   :  { %1104 = vrot.lane.b32.xlu0 %v3191_v44, %s4345_s24 }
 0xb7c   :  { %v1006_v2 = vpop.xlane.xlu1 %1005 }
 0xb7d   :  { %3414 = vrcp.f32 %v1006_v2  ;;  %v1350_v2 = vld [vmem:[%s4335_s9 + $0x10] sm:$0xff] }
 0xb7e   :  { %v1003_v3 = vpop.xlane.xlu0 %1002 }
 0xb7f   :  { %3416 = vrcp.f32 %v1003_v3  ;;  %v1349_v3 = vld [vmem:[%s4335_s9 + $0x8] sm:$0xff] }
 0xb80   :  { %v1097_v11 = vpop.permute.xlu1 %1096 }
 0xb81   :  { %v1117_v16 = vsel %vm230_vm2, %v3768_v53, %v1097_v11 }
 0xb82   :  { %v1095_v28 = vpop.permute.xlu0 %1094 }
 0xb83   :  { %v1116_v13 = vsel %vm230_vm2, %v3770_v55, %v1095_v28 }
 0xb84   :  { %v1103_v27 = vpop.permute.xlu1 %1102 }
 0xb85   :  { %v1118_v17 = vsel %vm316_vm3, %v1116_v13, %v1103_v27 }
 0xb86   :  { %v1105_v12 = vpop.permute.xlu0 %1104 }
 0xb87   :  { %v1119_v20 = vsel %vm316_vm3, %v1117_v16, %v1105_v12 }
 0xb8a   :  { %v3415_v4 = vpop.eup %3414 }
 0xb8b   :  { %v1010_v6 = vmul.f32 %v3415_v4, %v3411_v48  ;;  %v1354_v48 = vld [vmem:[%s4335_s9 + $0x30] sm:$0xff]  ;;  %v1348_v4 = vld [vmem:[%s4335_s9] sm:$0xff] }
 0xb8c   :  { %v3417_v5 = vpop.eup %3416 }
 0xb8d   :  { %v1009_v25 = vmul.f32 %v3417_v5, %v3413_v43  ;;  %v1352_v43 = vld [vmem:[%s4335_s9 + $0x20] sm:$0xff] }
 0xb8f   :  { %3203 = vmatprep.mubr.msk.f32.mxu0 %vm316_vm3, %v1009_v25 }
 0xb90   :  { %3204 = vmatmul.mubr.msk.f32.vlgmr.msra.gmra.mxu0 %vm316_vm3, %v1010_v6 }
 0xb91   :  { %3207 = vmatpush3.msra.mxu0 %v1126_v50 }
 0xb92   :  { %3208 = vmatprep.subr.mxu0 %v1125_v51 }
 0xb93   :  { %3209 = vmatpush3.msra.mxu0 %v1125_v51 }
 0xb94   :  { %3210 = vmatprep.subr.mxu0 %v1124_v7 }
 0xb95   :  { %3211 = vmatpush3.msra.mxu0 %v1124_v7 }
 0xb96   :  { %3212 = vmatprep.subr.mxu0 %v1123_v8 }
 0xb97   :  { %3213 = vmatpush3.msra.mxu0 %v1123_v8 }
 0xb98   :  { %3228 = vmatprep.subr.mxu0 %v1355_v62 }
 0xc50   :  { %v3205_v9 = vpop.f32.mrf.mxu0 }
 0xc51   :  { %1112 = vrot.lane.b32.xlu0 %v3205_v9, %s3493_s26 }
 0xc52   :  { %v1083_v10 = vpop.f32.mrf.mxu0 }
 0xc53   :  { %1110 = vrot.lane.b32.xlu1 %v1083_v10, %s3493_s26 }
 0xcc3   :  { %v1113_v14 = vpop.permute.xlu0 %1112 }
 0xcc4   :  { %v1122_v31 = vsel %vm1120_vm4, %v1119_v20, %v1113_v14 }
 0xcc5   :  { %v1111_v18 = vpop.permute.xlu1 %1110 }
 0xcc6   :  { %v1121_v22 = vsel %vm1120_vm4, %v1118_v17, %v1111_v18 }
 0xcc7   :  { %3214 = vmatprep.mubr.msk.f32.mxu0 %vm51_vm0, %v1121_v22 }
 0xcc8   :  { %3215 = vmatmul.mubr.msk.f32.vlgmr.msra.gmra.mxu0 %vm51_vm0, %v1122_v31 }
 0xcc9   :  { %3229 = vmatpush3.msra.mxu0 %v1355_v62 }
 0xcca   :  { %3230 = vmatprep.subr.mxu0 %v1354_v48 }
 0xccb   :  { %3231 = vmatpush3.msra.mxu0 %v1354_v48 }
 0xccc   :  { %3232 = vmatprep.subr.mxu0 %v1353_v61 }
 0xccd   :  { %3233 = vmatpush3.msra.mxu0 %v1353_v61 }
 0xcce   :  { %3234 = vmatprep.subr.mxu0 %v1352_v43 }
 0xccf   :  { %3235 = vmatpush3.msra.mxu0 %v1352_v43 }
 0xcd0   :  { %3236 = vmatprep.subr.mxu0 %v1351_v63 }
 0xcd1   :  { %3237 = vmatpush3.msra.mxu0 %v1351_v63 }
 0xcd2   :  { %3238 = vmatprep.subr.mxu0 %v1350_v2 }
 0xcd3   :  { %3239 = vmatpush3.msra.mxu0 %v1350_v2 }
 0xcd4   :  { %3240 = vmatprep.subr.mxu0 %v1349_v3 }
 0xcd5   :  { %3241 = vmatpush3.msra.mxu0 %v1349_v3 }
 0xcd6   :  { %3242 = vmatprep.subr.mxu0 %v1348_v4 }
 0xcd7   :  { %3243 = vmatpush3.msra.mxu0 %v1348_v4 }
 0xd88   :  { %v3216_v32 = vpop.f32.mrf.mxu0 }
 0xd89   :  { %v3903_v55 = vadd.f32 %v3216_v32, %v3569_v1  ;;  %v1238_v1 = vld [vmem:[%s4333_s8 + $0x18] sm:$0xff] }
 0xd8a   :  { %v1199_v35 = vpop.f32.mrf.mxu0  ;;  %3217 = vmatprep.subr.mxu1 %v1238_v1 }
 0xd8b   :  { %v3906_v53 = vadd.f32 %v1199_v35, %v3564_v0  ;;  %v1211_v36 = vmul.f32 %v3903_v55, %v3903_v55  ;;  %v1237_v0 = vld [vmem:[%s4333_s8 + $0x10] sm:$0xff]  ;;  %3218 = vmatpush3.msra.mxu1 %v1238_v1 }
 0xd8c   :  { %3219 = vmatprep.subr.mxu1 %v1237_v0 }
 0xd8d   :  { %v1215_v24 = vsel %vm51_vm0, %v1211_v36, 0.0  ;;  %v1210_v38 = vmul.f32 %v3906_v53, %v3906_v53  ;;  %3220 = vmatpush3.msra.mxu1 %v1237_v0 }
 0xd8e   :  { %1216 = vadd.xlane.f32.xlu0 %v1215_v24  ;;  %3221 = vmatprep.subr.mxu1 %v1236_v42 }
 0xd8f   :  { %v1212_v41 = vsel %vm51_vm0, %v1210_v38, 0.0  ;;  %3222 = vmatpush3.msra.mxu1 %v1236_v42 }
 0xd90   :  { %1213 = vadd.xlane.f32.xlu1 %v1212_v41  ;;  %3223 = vmatprep.subr.mxu1 %v1235_v23 }
 0xd91   :  { %3224 = vmatpush3.msra.mxu1 %v1235_v23 }
 0xe17   :  { %v1217_v44 = vpop.xlane.xlu0 %1216 }
 0xe18   :  { %v1219_v45 = vmul.f32 0.03125, %v1217_v44 }
 0xe19   :  { %v1214_v26 = vpop.xlane.xlu1 %1213 }
 0xe1a   :  { %v1221_v46 = vadd.f32 1e-06, %v1219_v45  ;;  %v1218_v47 = vmul.f32 0.03125, %v1214_v26  ;;  %v2957_v45 = vld [vmem:[%s4327_s6 + $0x28] sm:$0xff]  ;;  %v2956_v26 = vld [vmem:[%s4327_s6 + $0x20] sm:$0xff] }
 0xe1c   :  { %3418 = vrsqrt.f32 %v1221_v46  ;;  %v1220_v49 = vadd.f32 1e-06, %v1218_v47 }
 0xe1e   :  { %3420 = vrsqrt.f32 %v1220_v49 }
 0xe29   :  { %v3419_v54 = vpop.eup %3418 }
 0xe2a   :  { %v1225_v57 = vmul.f32 %v3419_v54, %v3903_v55 }
 0xe2b   :  { %v3421_v52 = vpop.eup %3420 }
 0xe2c   :  { %v1224_v58 = vmul.f32 %v3421_v52, %v3906_v53  ;;  %v1234_v60 = vmul.f32 %v2949_v56, %v1225_v57 }
 0xe2e   :  { %v1233_v59 = vmul.f32 %v2949_v56, %v1224_v58 }
 0xe30   :  { %3225 = vmatprep.mubr.msk.f32.mxu1 %vm51_vm0, %v1233_v59 }
 0xe31   :  { %3226 = vmatmul.mubr.msk.f32.vlgmr.msra.gmra.mxu1 %vm51_vm0, %v1234_v60  ;;  %v2955_v60 = vld [vmem:[%s4328_s4 + $0x1] ss:$0 sm:$0xff]  ;;  %s4353_s4 = smov 64  }
 0xef1   :  { %v3227_v5 = vpop.f32.mrf.mxu1 }
 0xef2   :  { %1342 = vrot.lane.b32.xlu1 %v3227_v5, %s4347_s25  ;;  %v1323_v50 = vmul.f32 0.044715, %v3227_v5  ;;  %v1321_v18 = vmul.f32 0.5, %v3227_v5 }
 0xef3   :  { %v1311_v25 = vpop.f32.mrf.mxu1 }
 0xef4   :  { %1340 = vrot.lane.b32.xlu0 %v1311_v25, %s4347_s25  ;;  %v1322_v6 = vmul.f32 0.044715, %v1311_v25  ;;  %v1325_v7 = vmul.f32 %v3227_v5, %v1323_v50  ;;  %v1320_v17 = vmul.f32 0.5, %v1311_v25 }
 0xef6   :  { %v1324_v51 = vmul.f32 %v1322_v6, %v1311_v25  ;;  %v1327_v9 = vmul.f32 %v3227_v5, %v1325_v7 }
 0xef8   :  { %v1326_v8 = vmul.f32 %v1324_v51, %v1311_v25  ;;  %v1329_v28 = vadd.f32 %v3227_v5, %v1327_v9 }
 0xefa   :  { %v1328_v10 = vadd.f32 %v1326_v8, %v1311_v25  ;;  %v1331_v12 = vmul.f32 0.7978846, %v1329_v28 }
 0xefc   :  { %v1330_v11 = vmul.f32 0.7978846, %v1328_v10 }
 0xefe   :  { %3422 = vtanh.f32 %v1330_v11 }
 0xeff   :  { %3424 = vtanh.f32 %v1331_v12 }
 0xf0b   :  { %v3423_v27 = vpop.eup %3422 }
 0xf0c   :  { %v3425_v13 = vpop.eup %3424  ;;  %v1334_v14 = vadd.f32 1.0, %v3423_v27 }
 0xf0d   :  { %v1335_v16 = vadd.f32 1.0, %v3425_v13  ;;  %v4031_v13 = vld [vmem:[%s4330_s2 + $0x8] sm:$0xff] }
 0xf0e   :  { %v1336_v22 = vmul.f32 %v1334_v14, %v1320_v17 }
 0xf0f   :  { %v1337_v31 = vmul.f32 %v1335_v16, %v1321_v18 }
 0xf64   :  { %v1343_v20 = vpop.permute.xlu1 %1342 }
 0xf65   :  { %v1347_v36 = vmul.f32 %v1343_v20, %v1337_v31 }
 0xf66   :  { %v1341_v32 = vpop.permute.xlu0 %1340 }
 0xf67   :  { %v1346_v35 = vmul.f32 %v1341_v32, %v1336_v22 }
 0xf69   :  { %3244 = vmatprep.mubr.msk.f32.mxu0 %vm1356_vm5, %v1346_v35 }
 0xf6a   :  { %3245 = vmatmul.mubr.msk.f32.vlgmr.msra.gmra.mxu0 %vm1356_vm5, %v1347_v36 }
0x102a   :  { %v3246_v24 = vpop.f32.mrf.mxu0 }
0x102b   :  { %v3962_v38 = vadd.f32 %v3246_v24, %v3903_v55  ;;  %v2959_v55 = vld [vmem:[%s4327_s6 + $0x38] sm:$0xff] }
0x102c   :  { %v1429_v41 = vpop.f32.mrf.mxu0  ;;  %3247 = vmatprep.subr.mxu1 %v2959_v55 }
0x102d   :  { %v3965_v1 = vadd.f32 %v1429_v41, %v3906_v53  ;;  %v1441_v0 = vmul.f32 %v3962_v38, %v3962_v38  ;;  %v2958_v53 = vld [vmem:[%s4327_s6 + $0x30] sm:$0xff]  ;;  %3248 = vmatpush3.msra.mxu1 %v2959_v55 }
0x102e   :  { %3249 = vmatprep.subr.mxu1 %v2958_v53 }
0x102f   :  { %v1445_v42 = vsel %vm51_vm0, %v1441_v0, 0.0  ;;  %v1440_v23 = vmul.f32 %v3965_v1, %v3965_v1  ;;  %3250 = vmatpush3.msra.mxu1 %v2958_v53 }
0x1030   :  { %1446 = vadd.xlane.f32.xlu0 %v1445_v42  ;;  %3251 = vmatprep.subr.mxu1 %v2957_v45 }
0x1031   :  { %v1442_v44 = vsel %vm51_vm0, %v1440_v23, 0.0  ;;  %3252 = vmatpush3.msra.mxu1 %v2957_v45 }
0x1032   :  { %1443 = vadd.xlane.f32.xlu1 %v1442_v44  ;;  %3253 = vmatprep.subr.mxu1 %v2956_v26 }
0x1033   :  { %3254 = vmatpush3.msra.mxu1 %v2956_v26 }
0x10b9   :  { %v1447_v46 = vpop.xlane.xlu0 %1446 }
0x10ba   :  { %v1449_v47 = vmul.f32 0.03125, %v1447_v46 }
0x10bb   :  { %v1444_v49 = vpop.xlane.xlu1 %1443 }
0x10bc   :  { %v1451_v54 = vadd.f32 1e-06, %v1449_v47  ;;  %v1448_v52 = vmul.f32 0.03125, %v1444_v49  ;;  %v3477_v47 = vld [vmem:[%s4329_s1 + $0x8] sm:$0xff] }
0x10be   :  { %3426 = vrsqrt.f32 %v1451_v54  ;;  %v1450_v57 = vadd.f32 1e-06, %v1448_v52 }
0x10c0   :  { %3428 = vrsqrt.f32 %v1450_v57 }
0x10cb   :  { %v3427_v58 = vpop.eup %3426 }
0x10cc   :  { %v1455_v59 = vmul.f32 %v3427_v58, %v3962_v38 }
0x10cd   :  { %v3429_v56 = vpop.eup %3428 }
0x10ce   :  { %v1454_v62 = vmul.f32 %v3429_v56, %v3965_v1  ;;  %v1465_v61 = vmul.f32 %v2955_v60, %v1455_v59  ;;  %v4103_v59 = vld [vmem:[%s4331_s3 + $0x8] sm:$0xff] }
0x10d0   :  { %v1464_v48 = vmul.f32 %v2955_v60, %v1454_v62 }
0x10d2   :  { %3255 = vmatprep.mubr.msk.f32.mxu1 %vm51_vm0, %v1464_v48  ;;  %v4109_v48 = vld [vmem:[%s4331_s3] sm:$0xff]  ;;  %s4349_s3 = smov 16  }
0x10d3   :  { %3256 = vmatmul.mubr.msk.f32.vlgmr.msra.gmra.mxu1 %vm51_vm0, %v1465_v61 }
0x1193   :  { %v3992_v43 = vpop.f32.mrf.mxu1 }
0x1194   :  { %1566 = vrot.lane.b32.xlu1 %v3992_v43, %s3480_s16  ;;  %v3997_v63 = vsub.f32 0.0, %v3992_v43  ;;  %v1601_v49 = vmul.f32 %v3477_v47, %v3992_v43 }
0x1195   :  { %v3999_v2 = vpop.f32.mrf.mxu1 }
0x1196   :  { %1558 = vrot.lane.b32.xlu0 %v3997_v63, %s3481_s17  ;;  %v4004_v3 = vsub.f32 0.0, %v3999_v2  ;;  %v1572_v18 = vmul.f32 %v3999_v2, %v3652_v40  ;;  %v1820_v31 = vmul.f32 %v3999_v2, %v3719_v29  ;;  %v3475_v29 = vld [vmem:[%s4329_s1] sm:$0xff] }
0x1197   :  { %v1600_v42 = vmul.f32 %v3475_v29, %v3999_v2 }
0x1198   :  { %1556 = vrot.lane.b32.xlu1 %v4004_v3, %s3481_s17 }
0x119a   :  { %1564 = vrot.lane.b32.xlu0 %v3999_v2, %s3480_s16 }
0x119c   :  { %1806 = vrot.lane.b32.xlu1 %v4004_v3, %s3486_s29 }
0x119e   :  { %1812 = vrot.lane.b32.xlu0 %v3999_v2, %s3482_s18 }
0x11a0   :  { %1808 = vrot.lane.b32.xlu1 %v3997_v63, %s3486_s29 }
0x11a2   :  { %1814 = vrot.lane.b32.xlu0 %v3992_v43, %s3482_s18 }
0x1206   :  { %v1567_v4 = vpop.permute.xlu1 %1566 }
0x1208   :  { %v1559_v5 = vpop.permute.xlu0 %1558 }
0x1209   :  { %v1571_v25 = vsel %vm179_vm1, %v1559_v5, %v1567_v4 }
0x120a   :  { %v1575_v6 = vmul.f32 %v1571_v25, %v3635_v30  ;;  %v1557_v50 = vpop.permute.xlu1 %1556 }
0x120c   :  { %v1565_v51 = vpop.permute.xlu0 %1564  ;;  %1580 = vrot.lane.b32.xlu1 %v1575_v6, %s3483_s21 }
0x120d   :  { %v1570_v7 = vsel %vm179_vm1, %v1557_v50, %v1565_v51 }
0x120e   :  { %v1574_v8 = vmul.f32 %v1570_v7, %v3642_v34  ;;  %v1807_v9 = vpop.permute.xlu1 %1806 }
0x1210   :  { %v1813_v10 = vpop.permute.xlu0 %1812  ;;  %1578 = vrot.lane.b32.xlu0 %v1574_v8, %s3483_s21 }
0x1211   :  { %v1818_v28 = vsel %vm179_vm1, %v1807_v9, %v1813_v10 }
0x1212   :  { %v1822_v11 = vmul.f32 %v1818_v28, %v3642_v34  ;;  %v1809_v12 = vpop.permute.xlu1 %1808  ;;  %v1573_v34 = vmul.f32 %v3992_v43, %v3650_v39  ;;  %v1821_v39 = vmul.f32 %v3992_v43, %v3729_v37  ;;  %v4065_v37 = vld [vmem:[%s4330_s2] sm:$0xff] }
0x1214   :  { %v1815_v27 = vpop.permute.xlu0 %1814  ;;  %1826 = vrot.lane.b32.xlu1 %v1822_v11, %s3487_s19 }
0x1215   :  { %v1819_v30 = vsel %vm179_vm1, %v1809_v12, %v1815_v27 }
0x1216   :  { %v1823_v14 = vmul.f32 %v4031_v13, %v1819_v30 }
0x1218   :  { %1592 = vrot.lane.b32.xlu1 %v3999_v2, %s3484_s28  ;;  %1828 = vrot.lane.b32.xlu0 %v1823_v14, %s3487_s19 }
0x121c   :  { %1586 = vrot.lane.b32.xlu0 %v4004_v3, %s3482_s18 }
0x1220   :  { %1588 = vrot.lane.b32.xlu0 %v3997_v63, %s3482_s18 }
0x127e   :  { %v1581_v16 = vpop.permute.xlu1 %1580 }
0x127f   :  { %v1585_v17 = vadd.f32 %v1581_v16, %v1573_v34 }
0x1281   :  { %1610 = vrot.lane.b32.xlu1 %v1585_v17, %s3485_s0 }
0x1282   :  { %v1579_v20 = vpop.permute.xlu0 %1578 }
0x1283   :  { %v1584_v22 = vadd.f32 %v1579_v20, %v1572_v18 }
0x1285   :  { %1608 = vrot.lane.b32.xlu0 %v1584_v22, %s3485_s0  ;;  %1594 = vrot.lane.b32.xlu1 %v3992_v43, %s3484_s28 }
0x1286   :  { %v1827_v32 = vpop.permute.xlu1 %1826 }
0x1287   :  { %v1832_v35 = vadd.f32 %v1827_v32, %v1820_v31 }
0x1289   :  { %1836 = vrot.lane.b32.xlu1 %v1832_v35, %s3489_s22 }
0x128a   :  { %v1829_v36 = vpop.permute.xlu0 %1828  ;;  %v1593_v40 = vpop.permute.xlu1 %1592 }
0x128b   :  { %v1833_v24 = vadd.f32 %v1829_v36, %v1821_v39 }
0x128d   :  { %1838 = vrot.lane.b32.xlu0 %v1833_v24, %s3489_s22  ;;  %2028 = vrot.lane.b32.xlu1 %v3999_v2, %s3486_s29 }
0x128e   :  { %v1587_v41 = vpop.permute.xlu0 %1586 }
0x128f   :  { %v1598_v0 = vsel %vm179_vm1, %v1587_v41, %v1593_v40 }
0x1290   :  { %v1602_v23 = vmul.f32 %v4065_v37, %v1598_v0 }
0x1291   :  { %2022 = vrot.lane.b32.xlu0 %v4004_v3, %s3490_s23 }
0x1292   :  { %v1604_v44 = vadd.f32 %v1602_v23, %v1600_v42  ;;  %v1589_v55 = vpop.permute.xlu0 %1588 }
0x1294   :  { %3262 = vmatprep.mubr.msk.f32.mxu1 %vm230_vm2, %v1604_v44  ;;  %v2036_v44 = vmul.f32 %v3999_v2, %v3792_v21  ;;  %v2037_v21 = vmul.f32 %v3992_v43, %v3799_v33 }
0x12f3   :  { %v4071_v53 = vpop.permute.xlu1 %1610 }
0x12f4   :  { %3258 = vmatprep.subr.msk.mxu1 %vm230_vm2, %v4071_v53 }
0x12f5   :  { %3259 = vmatpush3.xpose.msk.msra.mxu1 %vm230_vm2, %v4071_v53 }
0x12f7   :  { %v4077_v45 = vpop.permute.xlu0 %1608  ;;  %v1595_v26 = vpop.permute.xlu1 %1594 }
0x12f8   :  { %v1599_v46 = vsel %vm179_vm1, %v1589_v55, %v1595_v26  ;;  %3260 = vmatprep.subr.msk.mxu1 %vm230_vm2, %v4077_v45 }
0x12f9   :  { %v1603_v54 = vmul.f32 %v4031_v13, %v1599_v46  ;;  %3261 = vmatpush3.xpose.msk.msra.mxu1 %vm230_vm2, %v4077_v45 }
0x12fa   :  { %3272 = vmatprep.subr.msk.mxu1 %vm230_vm2, %v4071_v53 }
0x12fb   :  { %v1605_v52 = vadd.f32 %v1603_v54, %v1601_v49  ;;  %v1837_v57 = vpop.permute.xlu1 %1836 }
0x12fd   :  { %3263 = vmatmul.mubr.msk.f32.vlgmr.msra.gmra.mxu1 %vm230_vm2, %v1605_v52 }
0x12fe   :  { %3273 = vmatpush3.xpose.msk.msra.mxu1 %vm230_vm2, %v4071_v53  ;;  %3276 = vmatprep.mubr.msk.f32.mxu1 %vm230_vm2, %v1837_v57 }
0x12ff   :  { %3274 = vmatprep.subr.msk.mxu1 %vm230_vm2, %v4077_v45  ;;  %v1839_v58 = vpop.permute.xlu0 %1838  ;;  %v2029_v10 = vpop.permute.xlu1 %2028 }
0x1302   :  { %3275 = vmatpush3.xpose.msk.msra.mxu1 %vm230_vm2, %v4077_v45 }
0x1303   :  { %v2023_v9 = vpop.permute.xlu0 %2022 }
0x1304   :  { %v2034_v28 = vsel %vm179_vm1, %v2023_v9, %v2029_v10 }
0x1305   :  { %3277 = vmatmul.mubr.msk.f32.vlgmr.msra.gmra.mxu1 %vm230_vm2, %v1839_v58  ;;  %v2038_v11 = vmul.f32 %v4065_v37, %v2034_v28 }
0x13bd   :  { %v3264_v56 = vpop.f32.mrf.mxu1 }
0x13be   :  { %v1694_v60 = vadd.f32 %v4103_v59, %v3264_v56 }
0x13bf   :  { %v1688_v62 = vpop.f32.mrf.mxu1 }
0x13c0   :  { %v1689_v61 = vadd.f32 %v4109_v48, %v1688_v62  ;;  %v1700_v4 = vsel %vm316_vm3, %v1694_v60, -inf }
0x13c1   :  { %1701 = vmax.xlane.f32.xlu0 %v1700_v4 }
0x13c2   :  { %v1697_v5 = vsel %vm316_vm3, %v1689_v61, -inf }
0x13c3   :  { %1698 = vmax.xlane.f32.xlu1 %v1697_v5 }
0x13c5   :  { %v3278_v25 = vpop.f32.mrf.mxu1 }
0x13c6   :  { %v1916_v6 = vadd.f32 %v4103_v59, %v3278_v25 }
0x13c7   :  { %v1910_v50 = vpop.f32.mrf.mxu1 }
0x13c8   :  { %v1911_v51 = vadd.f32 %v4109_v48, %v1910_v50  ;;  %v1922_v7 = vsel %vm316_vm3, %v1916_v6, -inf }
0x13c9   :  { %1923 = vmax.xlane.f32.xlu1 %v1922_v7 }
0x13ca   :  { %v1919_v8 = vsel %vm316_vm3, %v1911_v51, -inf }
0x13cb   :  { %1920 = vmax.xlane.f32.xlu0 %v1919_v8 }
0x13da   :  { %2024 = vrot.lane.b32.xlu1 %v3997_v63, %s3490_s23 }
0x13de   :  { %2042 = vrot.lane.b32.xlu1 %v2038_v11, %s4349_s3 }
0x13e1   :  { %2030 = vrot.lane.b32.xlu0 %v3992_v43, %s3486_s29  ;;  %s4350_s29 = smov 88  }
0x144a   :  { %v1702_v14 = vpop.xlane.xlu0 %1701 }
0x144b   :  { %v1704_v36 = vsub.f32 %v1694_v60, %v1702_v14 }
0x144c   :  { %v1699_v12 = vpop.xlane.xlu1 %1698 }
0x144d   :  { %v1703_v27 = vsub.f32 %v1689_v61, %v1699_v12  ;;  %v1707_v41 = vmul.f32 1.442695, %v1704_v36 }
0x144f   :  { %v1705_v30 = vmul.f32 1.442695, %v1703_v27 }
0x1451   :  { %3430 = vpow2.f32 %v1705_v30 }
0x1452   :  { %v1924_v34 = vpop.xlane.xlu1 %1923 }
0x1453   :  { %v1926_v16 = vsub.f32 %v1916_v6, %v1924_v34 }
0x1454   :  { %v1921_v17 = vpop.xlane.xlu0 %1920 }
0x1455   :  { %v1929_v18 = vmul.f32 1.442695, %v1926_v16  ;;  %v1925_v0 = vsub.f32 %v1911_v51, %v1921_v17 }
0x1456   :  { %v2025_v20 = vpop.permute.xlu1 %2024 }
0x1457   :  { %3432 = vpow2.f32 %v1929_v18  ;;  %v1927_v29 = vmul.f32 1.442695, %v1925_v0 }
0x1458   :  { %v2031_v22 = vpop.permute.xlu0 %2030  ;;  %3434 = vpow2.f32 %v1707_v41 }
0x1459   :  { %v2035_v31 = vsel %vm179_vm1, %v2025_v20, %v2031_v22  ;;  %3436 = vpow2.f32 %v1927_v29 }
0x145a   :  { %v2039_v32 = vmul.f32 %v4031_v13, %v2035_v31  ;;  %v2043_v42 = vpop.permute.xlu1 %2042 }
0x145b   :  { %v2048_v55 = vadd.f32 %v2043_v42, %v2036_v44  ;;  %v2252_v44 = vmul.f32 %v3999_v2, %v3844_v15 }
0x145c   :  { %2044 = vrot.lane.b32.xlu0 %v2039_v32, %s4349_s3 }
0x145e   :  { %v3431_v35 = vpop.eup %3430 }
0x145f   :  { %v1709_v39 = vsel %vm316_vm3, %v3431_v35, 0.0 }
0x1460   :  { %1710 = vadd.xlane.f32.xlu1 %v1709_v39 }
0x1464   :  { %v3433_v24 = vpop.eup %3432 }
0x1465   :  { %v1934_v40 = vsel %vm316_vm3, %v3433_v24, 0.0  ;;  %v3435_v23 = vpop.eup %3434 }
0x1466   :  { %1935 = vadd.xlane.f32.xlu1 %v1934_v40  ;;  %v1712_v26 = vsel %vm316_vm3, %v3435_v23, 0.0  ;;  %v3437_v46 = vpop.eup %3436 }
0x1467   :  { %v1931_v47 = vsel %vm316_vm3, %v3437_v46, 0.0 }
0x1477   :  { %1719 = vrot.lane.b32.xlu1 %v3999_v2, %s4350_s29 }
0x147b   :  { %1713 = vadd.xlane.f32.xlu0 %v1712_v26  ;;  %2052 = vrot.lane.b32.xlu1 %v2048_v55, %s4351_s14 }
0x147f   :  { %1932 = vadd.xlane.f32.xlu0 %v1931_v47  ;;  %2244 = vrot.lane.b32.xlu1 %v3999_v2, %s3490_s23 }
0x1495   :  { %1721 = vrot.lane.b32.xlu0 %v3992_v43, %s4350_s29 }
0x14ce   :  { %v2045_v49 = vpop.permute.xlu0 %2044 }
0x14cf   :  { %v2049_v54 = vadd.f32 %v2045_v49, %v2037_v21 }
0x14d1   :  { %2054 = vrot.lane.b32.xlu0 %v2049_v54, %s4351_s14 }
0x14d5   :  { %2238 = vrot.lane.b32.xlu0 %v4004_v3, %s3480_s16 }
0x14e9   :  { %v1711_v52 = vpop.xlane.xlu1 %1710 }
0x14ea   :  { %3438 = vrcp.f32 %v1711_v52 }
0x14ef   :  { %v1936_v60 = vpop.xlane.xlu1 %1935 }
0x14f3   :  { %v1720_v61 = vpop.permute.xlu1 %1719 }
0x14f7   :  { %v3439_v57 = vpop.eup %3438  ;;  %v2053_v51 = vpop.permute.xlu1 %2052 }
0x14f8   :  { %v1717_v58 = vmul.f32 %v3439_v57, %v3431_v35 }
0x14fa   :  { %3269 = vmatprep.mubr.msk.f32.mxu0 %vm316_vm3, %v1717_v58 }
0x14fb   :  { %v2245_v17 = vpop.permute.xlu1 %2244 }
0x1504   :  { %v1714_v56 = vpop.xlane.xlu0 %1713 }
0x1505   :  { %3440 = vrcp.f32 %v1714_v56 }
0x1506   :  { %3442 = vrcp.f32 %v1936_v60 }
0x1508   :  { %v1933_v62 = vpop.xlane.xlu0 %1932 }
0x1509   :  { %3444 = vrcp.f32 %v1933_v62 }
0x150c   :  { %v1722_v33 = vpop.permute.xlu0 %1721 }
0x150d   :  { %3265 = vmatprep.subr.mxu0 %v1722_v33  ;;  %3293 = vmatprep.subr.mxu1 %v1722_v33 }
0x150e   :  { %3266 = vmatpush3.msra.mxu0 %v1722_v33  ;;  %3294 = vmatpush3.msra.mxu1 %v1722_v33 }
0x150f   :  { %3267 = vmatprep.subr.mxu0 %v1720_v61  ;;  %3295 = vmatprep.subr.mxu1 %v1720_v61 }
0x1510   :  { %3268 = vmatpush3.msra.mxu0 %v1720_v61  ;;  %3296 = vmatpush3.msra.mxu1 %v1720_v61 }
0x1511   :  { %3279 = vmatprep.subr.mxu0 %v1722_v33  ;;  %3300 = vmatprep.subr.msk.mxu1 %vm230_vm2, %v4071_v53 }
0x1512   :  { %v3441_v3 = vpop.eup %3440 }
0x1513   :  { %v1718_v4 = vmul.f32 %v3441_v3, %v3435_v23  ;;  %v3443_v5 = vpop.eup %3442 }
0x1514   :  { %v1940_v50 = vmul.f32 %v3443_v5, %v3433_v24 }
0x1515   :  { %3270 = vmatmul.mubr.msk.f32.vlgmr.msra.gmra.mxu0 %vm316_vm3, %v1718_v4 }
0x1516   :  { %v3445_v25 = vpop.eup %3444  ;;  %3280 = vmatpush3.msra.mxu0 %v1722_v33 }
0x1517   :  { %3281 = vmatprep.subr.mxu0 %v1720_v61  ;;  %v1939_v6 = vmul.f32 %v3445_v25, %v3437_v46 }
0x1518   :  { %3282 = vmatpush3.msra.mxu0 %v1720_v61 }
0x1519   :  { %3286 = vmatprep.subr.msk.mxu0 %vm230_vm2, %v4071_v53  ;;  %3283 = vmatprep.mubr.msk.f32.mxu0 %vm316_vm3, %v1939_v6 }
0x151a   :  { %3284 = vmatmul.mubr.msk.f32.vlgmr.msra.gmra.mxu0 %vm316_vm3, %v1940_v50 }
0x151b   :  { %3287 = vmatpush3.xpose.msk.msra.mxu0 %vm230_vm2, %v4071_v53  ;;  %3290 = vmatprep.mubr.msk.f32.mxu0 %vm230_vm2, %v2053_v51 }
0x151c   :  { %3288 = vmatprep.subr.msk.mxu0 %vm230_vm2, %v4077_v45 }
0x151f   :  { %3289 = vmatpush3.xpose.msk.msra.mxu0 %vm230_vm2, %v4077_v45 }
0x1520   :  { %3307 = vmatprep.subr.mxu0 %v1722_v33 }
0x1543   :  { %v2055_v7 = vpop.permute.xlu0 %2054 }
0x1544   :  { %3291 = vmatmul.mubr.msk.f32.vlgmr.msra.gmra.mxu0 %vm230_vm2, %v2055_v7 }
0x1545   :  { %3308 = vmatpush3.msra.mxu0 %v1722_v33 }
0x1546   :  { %3309 = vmatprep.subr.mxu0 %v1720_v61 }
0x1547   :  { %3310 = vmatpush3.msra.mxu0 %v1720_v61  ;;  %v2239_v16 = vpop.permute.xlu0 %2238 }
0x1548   :  { %v2250_v18 = vsel %vm179_vm1, %v2239_v16, %v2245_v17 }
0x1549   :  { %v2254_v20 = vmul.f32 %v4065_v37, %v2250_v18 }
0x15d5   :  { %v4162_v8 = vpop.f32.mrf.mxu0 }
0x15d7   :  { %v4164_v9 = vpop.f32.mrf.mxu0 }
0x15da   :  { %v4166_v10 = vpop.f32.mrf.mxu0 }
0x15dc   :  { %v4168_v28 = vpop.f32.mrf.mxu0 }
0x1604   :  { %v3292_v11 = vpop.f32.mrf.mxu0 }
0x1605   :  { %v2132_v12 = vadd.f32 %v4103_v59, %v3292_v11 }
0x1606   :  { %v2126_v27 = vpop.f32.mrf.mxu0 }
0x1607   :  { %v2127_v30 = vadd.f32 %v4109_v48, %v2126_v27  ;;  %v2138_v14 = vsel %vm316_vm3, %v2132_v12, -inf }
0x1608   :  { %2139 = vmax.xlane.f32.xlu0 %v2138_v14  ;;  %v2987_v14 = vld [vmem:[%s4332_s7 + $0x28] sm:$0xff] }
0x1609   :  { %v2135_v34 = vsel %vm316_vm3, %v2127_v30, -inf }
0x160a   :  { %2136 = vmax.xlane.f32.xlu1 %v2135_v34  ;;  %v2986_v34 = vld [vmem:[%s4332_s7 + $0x20] sm:$0xff] }
0x161b   :  { %2240 = vrot.lane.b32.xlu1 %v3997_v63, %s3480_s16  ;;  %s4352_s16 = smov 104  }
0x161e   :  { %2246 = vrot.lane.b32.xlu0 %v3992_v43, %s3490_s23 }
0x161f   :  { %2258 = vrot.lane.b32.xlu1 %v2254_v20, %s3493_s26 }
0x1691   :  { %v2140_v22 = vpop.xlane.xlu0 %2139 }
0x1692   :  { %v2142_v63 = vsub.f32 %v2132_v12, %v2140_v22 }
0x1693   :  { %v2137_v31 = vpop.xlane.xlu1 %2136 }
0x1694   :  { %v2141_v32 = vsub.f32 %v2127_v30, %v2137_v31  ;;  %v2145_v41 = vmul.f32 1.442695, %v2142_v63 }
0x1695   :  { %v2247_v39 = vpop.permute.xlu0 %2246 }
0x1696   :  { %v2143_v35 = vmul.f32 1.442695, %v2141_v32 }
0x1697   :  { %v2241_v36 = vpop.permute.xlu1 %2240 }
0x1698   :  { %3446 = vpow2.f32 %v2143_v35  ;;  %v2251_v24 = vsel %vm179_vm1, %v2241_v36, %v2247_v39 }
0x1699   :  { %v2255_v40 = vmul.f32 %v4031_v13, %v2251_v24  ;;  %3448 = vpow2.f32 %v2145_v41  ;;  %v2253_v13 = vmul.f32 %v3992_v43, %v3849_v19 }
0x169b   :  { %2260 = vrot.lane.b32.xlu0 %v2255_v40, %s3493_s26  ;;  %v2259_v23 = vpop.permute.xlu1 %2258 }
0x169c   :  { %v2264_v55 = vadd.f32 %v2259_v23, %v2252_v44 }
0x16a5   :  { %v3447_v37 = vpop.eup %3446 }
0x16a6   :  { %v2147_v0 = vsel %vm316_vm3, %v3447_v37, 0.0  ;;  %v3449_v29 = vpop.eup %3448 }
0x16a7   :  { %2148 = vadd.xlane.f32.xlu1 %v2147_v0  ;;  %v2150_v42 = vsel %vm316_vm3, %v3449_v29, 0.0 }
0x16ba   :  { %2151 = vadd.xlane.f32.xlu0 %v2150_v42 }
0x16d0   :  { %2268 = vrot.lane.b32.xlu0 %v2264_v55, %s4352_s16  ;;  %v2995_v55 = vld [vmem:[%s4333_s8 + $0x28] sm:$0xff] }
0x170d   :  { %v2261_v26 = vpop.permute.xlu0 %2260 }
0x170e   :  { %v2265_v46 = vadd.f32 %v2261_v26, %v2253_v13  ;;  %v2994_v13 = vld [vmem:[%s4333_s8 + $0x20] sm:$0xff] }
0x1710   :  { %2270 = vrot.lane.b32.xlu1 %v2265_v46, %s4352_s16 }
0x1730   :  { %v2149_v47 = vpop.xlane.xlu1 %2148 }
0x1731   :  { %3450 = vrcp.f32 %v2149_v47 }
0x173e   :  { %v3451_v21 = vpop.eup %3450 }
0x173f   :  { %v2155_v49 = vmul.f32 %v3451_v21, %v3447_v37 }
0x1741   :  { %3297 = vmatprep.mubr.msk.f32.mxu1 %vm316_vm3, %v2155_v49 }
0x1743   :  { %v2152_v54 = vpop.xlane.xlu0 %2151 }
0x1744   :  { %3452 = vrcp.f32 %v2152_v54 }
0x1747   :  { %v2269_v2 = vpop.permute.xlu0 %2268 }
0x1751   :  { %v3453_v52 = vpop.eup %3452 }
0x1752   :  { %v2156_v15 = vmul.f32 %v3453_v52, %v3449_v29 }
0x1754   :  { %3298 = vmatmul.mubr.msk.f32.vlgmr.msra.gmra.mxu1 %vm316_vm3, %v2156_v15 }
0x1755   :  { %3301 = vmatpush3.xpose.msk.msra.mxu1 %vm230_vm2, %v4071_v53  ;;  %3304 = vmatprep.mubr.msk.f32.mxu1 %vm230_vm2, %v2269_v2 }
0x1756   :  { %3302 = vmatprep.subr.msk.mxu1 %vm230_vm2, %v4077_v45 }
0x1759   :  { %3303 = vmatpush3.xpose.msk.msra.mxu1 %vm230_vm2, %v4077_v45 }
0x1782   :  { %v2271_v19 = vpop.permute.xlu1 %2270 }
0x1783   :  { %3305 = vmatmul.mubr.msk.f32.vlgmr.msra.gmra.mxu1 %vm230_vm2, %v2271_v19 }
0x1814   :  { %v3299_v43 = vpop.f32.mrf.mxu1 }
0x1816   :  { %v2229_v57 = vpop.f32.mrf.mxu1 }
0x1843   :  { %v3306_v58 = vpop.f32.mrf.mxu1 }
0x1844   :  { %v2348_v56 = vadd.f32 %v4103_v59, %v3306_v58 }
0x1845   :  { %v2342_v60 = vpop.f32.mrf.mxu1 }
0x1846   :  { %v2343_v62 = vadd.f32 %v4109_v48, %v2342_v60  ;;  %v2354_v53 = vsel %vm316_vm3, %v2348_v56, -inf  ;;  %v3006_v60 = vld [vmem:[%s4335_s9 + $0x70] sm:$0xff] }
0x1847   :  { %2355 = vmax.xlane.f32.xlu0 %v2354_v53  ;;  %v3004_v53 = vld [vmem:[%s4335_s9 + $0x60] sm:$0xff] }
0x1848   :  { %v2351_v33 = vsel %vm316_vm3, %v2343_v62, -inf }
0x1849   :  { %2352 = vmax.xlane.f32.xlu1 %v2351_v33  ;;  %v3003_v33 = vld [vmem:[%s4335_s9 + $0x58] sm:$0xff] }
0x18d0   :  { %v2356_v61 = vpop.xlane.xlu0 %2355 }
0x18d1   :  { %v2358_v3 = vsub.f32 %v2348_v56, %v2356_v61  ;;  %v3007_v56 = vld [vmem:[%s4335_s9 + $0x78] sm:$0xff]  ;;  %v3002_v61 = vld [vmem:[%s4335_s9 + $0x50] sm:$0xff] }
0x18d2   :  { %v2353_v45 = vpop.xlane.xlu1 %2352 }
0x18d3   :  { %v2361_v4 = vmul.f32 1.442695, %v2358_v3  ;;  %v2357_v5 = vsub.f32 %v2343_v62, %v2353_v45  ;;  %v3005_v62 = vld [vmem:[%s4335_s9 + $0x68] sm:$0xff]  ;;  %v3000_v45 = vld [vmem:[%s4335_s9 + $0x40] sm:$0xff] }
0x18d4   :  { %v3001_v3 = vld [vmem:[%s4335_s9 + $0x48] sm:$0xff] }
0x18d5   :  { %3454 = vpow2.f32 %v2361_v4  ;;  %v2359_v25 = vmul.f32 1.442695, %v2357_v5 }
0x18d7   :  { %3456 = vpow2.f32 %v2359_v25 }
0x18e2   :  { %v3455_v6 = vpop.eup %3454 }
0x18e3   :  { %v2366_v59 = vsel %vm316_vm3, %v3455_v6, 0.0 }
0x18e4   :  { %v3457_v50 = vpop.eup %3456  ;;  %2367 = vadd.xlane.f32.xlu1 %v2366_v59 }
0x18e5   :  { %v2363_v48 = vsel %vm316_vm3, %v3457_v50, 0.0 }
0x18e6   :  { %2364 = vadd.xlane.f32.xlu0 %v2363_v48 }
0x18f5   :  { %2458 = vrot.lane.b32.xlu1 %v4166_v10, %s3487_s19  ;;  %v2989_v10 = vld [vmem:[%s4332_s7 + $0x38] sm:$0xff] }
0x18f6   :  { %3314 = vmatprep.subr.mxu0 %v2989_v10 }
0x18f9   :  { %2464 = vrot.lane.b32.xlu1 %v2229_v57, %s4349_s3 }
0x18fc   :  { %2456 = vrot.lane.b32.xlu0 %v4168_v28, %s3487_s19  ;;  %v2988_v28 = vld [vmem:[%s4332_s7 + $0x30] sm:$0xff] }
0x1900   :  { %2466 = vrot.lane.b32.xlu0 %v3299_v43, %s4349_s3  ;;  %v2993_v43 = vld [vmem:[%s4334_s5 + $0x1] ss:$0 sm:$0xff] }
0x196d   :  { %v2368_v51 = vpop.xlane.xlu1 %2367 }
0x196e   :  { %3458 = vrcp.f32 %v2368_v51 }
0x196f   :  { %v2365_v7 = vpop.xlane.xlu0 %2364 }
0x1970   :  { %3460 = vrcp.f32 %v2365_v7 }
0x1971   :  { %v2459_v20 = vpop.permute.xlu1 %2458 }
0x1972   :  { %v2479_v39 = vsel %vm230_vm2, %v4162_v8, %v2459_v20 }
0x1973   :  { %v2457_v18 = vpop.permute.xlu0 %2456 }
0x1974   :  { %v2478_v32 = vsel %vm230_vm2, %v4164_v9, %v2457_v18 }
0x1975   :  { %v2465_v31 = vpop.permute.xlu1 %2464 }
0x1976   :  { %v2480_v36 = vsel %vm316_vm3, %v2478_v32, %v2465_v31 }
0x1977   :  { %v2467_v22 = vpop.permute.xlu0 %2466 }
0x1978   :  { %v2481_v40 = vsel %vm316_vm3, %v2479_v39, %v2467_v22 }
0x197b   :  { %v3459_v11 = vpop.eup %3458 }
0x197c   :  { %v2372_v30 = vmul.f32 %v3459_v11, %v3455_v6 }
0x197d   :  { %v3461_v12 = vpop.eup %3460 }
0x197e   :  { %v2371_v27 = vmul.f32 %v3461_v12, %v3457_v50 }
0x1980   :  { %3311 = vmatprep.mubr.msk.f32.mxu0 %vm316_vm3, %v2371_v27 }
0x1981   :  { %3312 = vmatmul.mubr.msk.f32.vlgmr.msra.gmra.mxu0 %vm316_vm3, %v2372_v30 }
0x1982   :  { %3315 = vmatpush3.msra.mxu0 %v2989_v10 }
0x1983   :  { %3316 = vmatprep.subr.mxu0 %v2988_v28 }
0x1984   :  { %3317 = vmatpush3.msra.mxu0 %v2988_v28 }
0x1985   :  { %3318 = vmatprep.subr.mxu0 %v2987_v14 }
0x1986   :  { %3319 = vmatpush3.msra.mxu0 %v2987_v14 }
0x1987   :  { %3320 = vmatprep.subr.mxu0 %v2986_v34 }
0x1988   :  { %3321 = vmatpush3.msra.mxu0 %v2986_v34 }
0x1989   :  { %3336 = vmatprep.subr.mxu0 %v3007_v56 }
0x1a41   :  { %v3313_v16 = vpop.f32.mrf.mxu0 }
0x1a42   :  { %2474 = vrot.lane.b32.xlu0 %v3313_v16, %s3493_s26 }
0x1a43   :  { %v2445_v17 = vpop.f32.mrf.mxu0 }
0x1a44   :  { %2472 = vrot.lane.b32.xlu1 %v2445_v17, %s3493_s26 }
0x1ab4   :  { %v2475_v35 = vpop.permute.xlu0 %2474 }
0x1ab5   :  { %v2483_v37 = vsel %vm1120_vm4, %v2481_v40, %v2475_v35 }
0x1ab6   :  { %v2473_v24 = vpop.permute.xlu1 %2472 }
0x1ab7   :  { %v2482_v63 = vsel %vm1120_vm4, %v2480_v36, %v2473_v24 }
0x1ab8   :  { %3322 = vmatprep.mubr.msk.f32.mxu0 %vm51_vm0, %v2482_v63 }
0x1ab9   :  { %3323 = vmatmul.mubr.msk.f32.vlgmr.msra.gmra.mxu0 %vm51_vm0, %v2483_v37 }
0x1aba   :  { %3337 = vmatpush3.msra.mxu0 %v3007_v56 }
0x1abb   :  { %3338 = vmatprep.subr.mxu0 %v3006_v60 }
0x1abc   :  { %3339 = vmatpush3.msra.mxu0 %v3006_v60 }
0x1abd   :  { %3340 = vmatprep.subr.mxu0 %v3005_v62 }
0x1abe   :  { %3341 = vmatpush3.msra.mxu0 %v3005_v62 }
0x1abf   :  { %3342 = vmatprep.subr.mxu0 %v3004_v53 }
0x1ac0   :  { %3343 = vmatpush3.msra.mxu0 %v3004_v53 }
0x1ac1   :  { %3344 = vmatprep.subr.mxu0 %v3003_v33 }
0x1ac2   :  { %3345 = vmatpush3.msra.mxu0 %v3003_v33 }
0x1ac3   :  { %3346 = vmatprep.subr.mxu0 %v3002_v61 }
0x1ac4   :  { %3347 = vmatpush3.msra.mxu0 %v3002_v61 }
0x1ac5   :  { %3348 = vmatprep.subr.mxu0 %v3001_v3 }
0x1ac6   :  { %3349 = vmatpush3.msra.mxu0 %v3001_v3 }
0x1ac7   :  { %3350 = vmatprep.subr.mxu0 %v3000_v45 }
0x1ac8   :  { %3351 = vmatpush3.msra.mxu0 %v3000_v45 }
0x1b79   :  { %v3324_v41 = vpop.f32.mrf.mxu0 }
0x1b7a   :  { %v4241_v9 = vadd.f32 %v3324_v41, %v3962_v38  ;;  %v2997_v38 = vld [vmem:[%s4333_s8 + $0x38] sm:$0xff] }
0x1b7b   :  { %v2561_v0 = vpop.f32.mrf.mxu0  ;;  %3325 = vmatprep.subr.mxu1 %v2997_v38 }
0x1b7c   :  { %v4244_v8 = vadd.f32 %v2561_v0, %v3965_v1  ;;  %v2573_v29 = vmul.f32 %v4241_v9, %v4241_v9  ;;  %v2996_v1 = vld [vmem:[%s4333_s8 + $0x30] sm:$0xff]  ;;  %3326 = vmatpush3.msra.mxu1 %v2997_v38  ;;  %v2832_v0 = vld [vmem:[%s4336_s11 + $0x18] sm:$0xff] }
0x1b7d   :  { %3327 = vmatprep.subr.mxu1 %v2996_v1 }
0x1b7e   :  { %v2577_v42 = vsel %vm51_vm0, %v2573_v29, 0.0  ;;  %v2572_v23 = vmul.f32 %v4244_v8, %v4244_v8  ;;  %3328 = vmatpush3.msra.mxu1 %v2996_v1  ;;  %v2831_v29 = vld [vmem:[%s4336_s11 + $0x10] sm:$0xff] }
0x1b7f   :  { %2578 = vadd.xlane.f32.xlu0 %v2577_v42  ;;  %3329 = vmatprep.subr.mxu1 %v2995_v55 }
0x1b80   :  { %v2574_v44 = vsel %vm51_vm0, %v2572_v23, 0.0  ;;  %3330 = vmatpush3.msra.mxu1 %v2995_v55 }
0x1b81   :  { %2575 = vadd.xlane.f32.xlu1 %v2574_v44  ;;  %3331 = vmatprep.subr.mxu1 %v2994_v13 }
0x1b82   :  { %3332 = vmatpush3.msra.mxu1 %v2994_v13 }
0x1b83   :  { %3355 = vmatprep.subr.mxu1 %v2832_v0 }
0x1c08   :  { %v2579_v26 = vpop.xlane.xlu0 %2578 }
0x1c09   :  { %v2581_v46 = vmul.f32 0.03125, %v2579_v26 }
0x1c0a   :  { %v2576_v47 = vpop.xlane.xlu1 %2575 }
0x1c0b   :  { %v2583_v21 = vadd.f32 1e-06, %v2581_v46  ;;  %v2580_v49 = vmul.f32 0.03125, %v2576_v47 }
0x1c0d   :  { %3462 = vrsqrt.f32 %v2583_v21  ;;  %v2582_v54 = vadd.f32 1e-06, %v2580_v49  ;;  %v3010_v21 = vld [vmem:[%s4337_s10] ss:$0 sm:$0xff] }
0x1c0f   :  { %3464 = vrsqrt.f32 %v2582_v54 }
0x1c1a   :  { %v3463_v52 = vpop.eup %3462 }
0x1c1b   :  { %v2587_v2 = vmul.f32 %v3463_v52, %v4241_v9 }
0x1c1c   :  { %v3465_v15 = vpop.eup %3464 }
0x1c1d   :  { %v2586_v19 = vmul.f32 %v3465_v15, %v4244_v8  ;;  %v2597_v58 = vmul.f32 %v2993_v43, %v2587_v2 }
0x1c1f   :  { %v2596_v57 = vmul.f32 %v2993_v43, %v2586_v19 }
0x1c21   :  { %3333 = vmatprep.mubr.msk.f32.mxu1 %vm51_vm0, %v2596_v57 }
0x1c22   :  { %3334 = vmatmul.mubr.msk.f32.vlgmr.msra.gmra.mxu1 %vm51_vm0, %v2597_v58 }
0x1c23   :  { %3356 = vmatpush3.msra.mxu1 %v2832_v0 }
0x1c24   :  { %3357 = vmatprep.subr.mxu1 %v2831_v29 }
0x1c25   :  { %3358 = vmatpush3.msra.mxu1 %v2831_v29 }
0x1ce2   :  { %v3335_v4 = vpop.f32.mrf.mxu1 }
0x1ce3   :  { %2706 = vrot.lane.b32.xlu1 %v3335_v4, %s4353_s4  ;;  %v2687_v6 = vmul.f32 0.044715, %v3335_v4  ;;  %v2685_v16 = vmul.f32 0.5, %v3335_v4 }
0x1ce4   :  { %v2675_v5 = vpop.f32.mrf.mxu1 }
0x1ce5   :  { %2704 = vrot.lane.b32.xlu0 %v2675_v5, %s4353_s4  ;;  %v2686_v25 = vmul.f32 0.044715, %v2675_v5  ;;  %v2689_v50 = vmul.f32 %v3335_v4, %v2687_v6  ;;  %v2684_v34 = vmul.f32 0.5, %v2675_v5 }
0x1ce7   :  { %v2688_v59 = vmul.f32 %v2686_v25, %v2675_v5  ;;  %v2691_v51 = vmul.f32 %v3335_v4, %v2689_v50 }
0x1ce9   :  { %v2690_v48 = vmul.f32 %v2688_v59, %v2675_v5  ;;  %v2693_v11 = vadd.f32 %v3335_v4, %v2691_v51 }
0x1ceb   :  { %v2692_v7 = vadd.f32 %v2690_v48, %v2675_v5  ;;  %v2695_v27 = vmul.f32 0.7978846, %v2693_v11 }
0x1ced   :  { %v2694_v12 = vmul.f32 0.7978846, %v2692_v7 }
0x1cef   :  { %3466 = vtanh.f32 %v2694_v12 }
0x1cf0   :  { %3468 = vtanh.f32 %v2695_v27 }
0x1cfc   :  { %v3467_v30 = vpop.eup %3466 }
0x1cfd   :  { %v3469_v10 = vpop.eup %3468  ;;  %v2698_v28 = vadd.f32 1.0, %v3467_v30 }
0x1cfe   :  { %v2699_v14 = vadd.f32 1.0, %v3469_v10 }
0x1cff   :  { %v2700_v18 = vmul.f32 %v2698_v28, %v2684_v34 }
0x1d00   :  { %v2701_v20 = vmul.f32 %v2699_v14, %v2685_v16 }
0x1d55   :  { %v2707_v17 = vpop.permute.xlu1 %2706 }
0x1d56   :  { %v2711_v32 = vmul.f32 %v2707_v17, %v2701_v20 }
0x1d57   :  { %v2705_v22 = vpop.permute.xlu0 %2704 }
0x1d58   :  { %v2710_v31 = vmul.f32 %v2705_v22, %v2700_v18 }
0x1d5a   :  { %3352 = vmatprep.mubr.msk.f32.mxu0 %vm1356_vm5, %v2710_v31 }
0x1d5b   :  { %3353 = vmatmul.mubr.msk.f32.vlgmr.msra.gmra.mxu0 %vm1356_vm5, %v2711_v32 }
0x1e1b   :  { %v3354_v35 = vpop.f32.mrf.mxu0 }
0x1e1c   :  { %v2803_v39 = vadd.f32 %v3354_v35, %v4241_v9  ;;  %v2830_v9 = vld [vmem:[%s4336_s11 + $0x8] sm:$0xff] }
0x1e1d   :  { %v2793_v36 = vpop.f32.mrf.mxu0  ;;  %3359 = vmatprep.subr.mxu1 %v2830_v9 }
0x1e1e   :  { %v2805_v24 = vmul.f32 %v2803_v39, %v2803_v39  ;;  %v2802_v40 = vadd.f32 %v2793_v36, %v4244_v8  ;;  %v2829_v8 = vld [vmem:[%s4336_s11] sm:$0xff]  ;;  %3360 = vmatpush3.msra.mxu1 %v2830_v9 }
0x1e1f   :  { %3361 = vmatprep.subr.mxu1 %v2829_v8 }
0x1e20   :  { %v2804_v63 = vmul.f32 %v2802_v40, %v2802_v40  ;;  %v2809_v37 = vsel %vm51_vm0, %v2805_v24, 0.0  ;;  %3362 = vmatpush3.msra.mxu1 %v2829_v8 }
0x1e21   :  { %2810 = vadd.xlane.f32.xlu0 %v2809_v37 }
0x1e22   :  { %v2806_v41 = vsel %vm51_vm0, %v2804_v63, 0.0 }
0x1e23   :  { %2807 = vadd.xlane.f32.xlu1 %v2806_v41 }
0x1eaa   :  { %v2811_v42 = vpop.xlane.xlu0 %2810 }
0x1eab   :  { %v2813_v23 = vmul.f32 0.03125, %v2811_v42 }
0x1eac   :  { %v2808_v44 = vpop.xlane.xlu1 %2807 }
0x1ead   :  { %v2815_v38 = vadd.f32 1e-06, %v2813_v23  ;;  %v2812_v1 = vmul.f32 0.03125, %v2808_v44 }
0x1eaf   :  { %3470 = vrsqrt.f32 %v2815_v38  ;;  %v2814_v55 = vadd.f32 1e-06, %v2812_v1 }
0x1eb1   :  { %3472 = vrsqrt.f32 %v2814_v55 }
0x1ebc   :  { %v3471_v13 = vpop.eup %3470 }
0x1ebd   :  { %v2819_v46 = vmul.f32 %v3471_v13, %v2803_v39 }
0x1ebe   :  { %v3473_v26 = vpop.eup %3472 }
0x1ebf   :  { %v2818_v47 = vmul.f32 %v3473_v26, %v2802_v40  ;;  %v2828_v54 = vmul.f32 %v3010_v21, %v2819_v46 }
0x1ec1   :  { %v2827_v49 = vmul.f32 %v3010_v21, %v2818_v47 }
0x1ec3   :  { %3363 = vmatprep.mubr.msk.f32.mxu1 %vm51_vm0, %v2827_v49 }
0x1ec4   :  { %3364 = vmatmul.mubr.msk.f32.vlgmr.msra.gmra.mxu1 %vm51_vm0, %v2828_v54 }
0x1f84   :  { %v3365_v52 = vpop.f32.mrf.mxu1 }
0x1f85   :  { %2915 = vst [vmem:[%s4338_s12 + $0x8] sm:$0xff] %v3365_v52 }
0x1f86   :  { %v2905_v15 = vpop.f32.mrf.mxu1 }
0x1f87   :  { %2914 = vst [vmem:[%s4338_s12] sm:$0xff] %v2905_v15 }

</bundles_post_ra>
